<compile_context>
chip_gen: v5e
topology: v5e:2x2
jax: 0.10.0
libtpu: 0.0.40
codegen_flags: <defaults>
</compile_context>

<pallas_src>
import math
import functools

import jax
import jax.numpy as jnp
from jax.experimental import pallas as pl
from jax.experimental.pallas import tpu as pltpu


def _layer_norm(x, gamma, beta, eps=1e-5):
    # PyTorch nn.LayerNorm: biased variance, eps inside sqrt. All f32.
    mu = jnp.mean(x, axis=-1, keepdims=True)
    var = jnp.mean((x - mu) ** 2, axis=-1, keepdims=True)
    return (x - mu) * jax.lax.rsqrt(var + eps) * gamma + beta


def _new_gelu(x):
    # NewGELU: 0.5*x*(1 + tanh(sqrt(2/pi)*(x + 0.044715*x^3)))   (f32, tanh on EUP)
    c = math.sqrt(2.0 / math.pi)
    return 0.5 * x * (1.0 + jnp.tanh(c * (x + 0.044715 * x * x * x)))


# ---------------------------------------------------------------------------
# Kernel 1: LN1 + per-head QKV projection. Outputs q/k/v in (B, H, T, hd) bf16,
# with the 1/sqrt(hd) attention scale folded into q.
# ---------------------------------------------------------------------------
def _qkv_kernel(x_ref, ln1_g_ref, ln1_b_ref,
                wq_ref, wk_ref, wv_ref, bq_ref, bk_ref, bv_ref,
                q_ref, k_ref, v_ref, *, n_head, scale):
    x = x_ref[0]                                                  # (TQ, C) f32
    xn = _layer_norm(x, ln1_g_ref[...], ln1_b_ref[...])           # f32
    xn_bf = xn.astype(jnp.bfloat16)

    # Static, small head loop; each head is computed and stored immediately
    # (bounded live ranges, no lane-dim slicing or concatenation).
    for h in range(n_head):
        qh = jnp.dot(xn_bf, wq_ref[h], preferred_element_type=jnp.float32) + bq_ref[h]
        kh = jnp.dot(xn_bf, wk_ref[h], preferred_element_type=jnp.float32) + bk_ref[h]
        vh = jnp.dot(xn_bf, wv_ref[h], preferred_element_type=jnp.float32) + bv_ref[h]
        q_ref[0, h] = (qh * scale).astype(q_ref.dtype)
        k_ref[0, h] = kh.astype(k_ref.dtype)
        v_ref[0, h] = vh.astype(v_ref.dtype)


# ---------------------------------------------------------------------------
# Kernel 2: head-batched attention + output projection + residual + LN2 + MLP + residual.
# ---------------------------------------------------------------------------
def _attn_mlp_kernel(x_ref, q_ref, k_ref, v_ref,
                     wproj_ref, bproj_ref, ln2_g_ref, ln2_b_ref,
                     wfc_ref, bfc_ref, wout_ref, bout_ref,
                     o_ref, *, n_head):
    x = x_ref[0]                                                  # (TQ, C) f32
    q = q_ref[0]                                                  # (H, TQ, hd) bf16 (pre-scaled)
    k = k_ref[0]                                                  # (H, T,  hd) bf16
    v = v_ref[0]                                                  # (H, T,  hd) bf16
    TQ, C = x.shape

    # Head-batched scores, softmax in f32 (stable; divide -> EUP approx reciprocal).
    att = jnp.einsum('hqd,hkd->hqk', q, k,
                     preferred_element_type=jnp.float32)          # (H, TQ, T) f32
    att = att - jnp.max(att, axis=-1, keepdims=True)
    p = jnp.exp(att)
    denom = jnp.sum(p, axis=-1, keepdims=True)
    p = p * pl.reciprocal(denom, approx=True)

    y = jnp.einsum('hqk,hkd->hqd', p.astype(jnp.bfloat16), v,
                   preferred_element_type=jnp.float32)            # (H, TQ, hd) f32

    # Output projection: accumulate per head into a lane-dense (TQ, C) f32 slab
    # (no concatenate, only the accumulator stays live).
    proj = jnp.zeros((TQ, C), jnp.float32)
    for h in range(n_head):
        proj = proj + jnp.dot(y[h].astype(jnp.bfloat16), wproj_ref[h],
                              preferred_element_type=jnp.float32)
    proj = proj + bproj_ref[...]

    x1 = x + proj                                                 # residual 1 (f32)

    xn2 = _layer_norm(x1, ln2_g_ref[...], ln2_b_ref[...])
    h1 = jnp.dot(xn2.astype(jnp.bfloat16), wfc_ref[...],
                 preferred_element_type=jnp.float32) + bfc_ref[...]   # (TQ, 4C) f32
    h1 = _new_gelu(h1)
    h2 = jnp.dot(h1.astype(jnp.bfloat16), wout_ref[...],
                 preferred_element_type=jnp.float32) + bout_ref[...]  # (TQ, C) f32

    o_ref[0] = (x1 + h2).astype(o_ref.dtype)                      # residual 2


# ---------------------------------------------------------------------------
# Wrapper: weight layout plumbing (per-head splits, bf16 casts) + pallas_calls.
# ---------------------------------------------------------------------------
def _prep_weights(params, n_head):
    C = params["w_proj"].shape[0]
    hd = C // n_head
    w_attn = params["w_attn"]                 # (C, 3C), columns = [q | k | v], head-major within each
    b_attn = params["b_attn"].reshape(-1)     # (3C,)

    def head_w(col0):                         # (C, C) -> (H, C, hd)  bf16
        w = w_attn[:, col0:col0 + C]
        return jnp.transpose(w.reshape(C, n_head, hd), (1, 0, 2)).astype(jnp.bfloat16)

    def head_b(col0):                         # (C,) -> (H, 1, hd)  f32
        return b_attn[col0:col0 + C].reshape(n_head, 1, hd).astype(jnp.float32)

    return dict(
        ln1_g=params["ln1_g"].astype(jnp.float32), ln1_b=params["ln1_b"].astype(jnp.float32),
        wq=head_w(0), wk=head_w(C), wv=head_w(2 * C),
        bq=head_b(0), bk=head_b(C), bv=head_b(2 * C),
        wproj=params["w_proj"].reshape(n_head, hd, C).astype(jnp.bfloat16),   # rows are head-major
        bproj=params["b_proj"].astype(jnp.float32),
        ln2_g=params["ln2_g"].astype(jnp.float32), ln2_b=params["ln2_b"].astype(jnp.float32),
        wfc=params["w_fc"].astype(jnp.bfloat16), bfc=params["b_fc"].astype(jnp.float32),
        wout=params["w_out"].astype(jnp.bfloat16), bout=params["b_out"].astype(jnp.float32),
    )


def noncausal_block(x, params, n_head, *, tq=None, single_buffer_weights=True):
    B, T, C = x.shape
    assert C % n_head == 0, "n_embd must be divisible by n_head"
    hd = C // n_head
    if tq is None:
        tq = 128 if T % 128 == 0 else T
    assert T % tq == 0
    nt = T // tq
    scale = 1.0 / math.sqrt(hd)

    p = _prep_weights(params, n_head)

    def wspec(shape):
        # Constant index_map: the block is fetched once. Single-buffer it to avoid
        # paying 2x VMEM for never-refetched weights (falls back to default buffering).
        zeros = (0,) * len(shape)
        idx = lambda b, t: zeros
        if single_buffer_weights:
            return pl.BlockSpec(shape, idx, pipeline_mode=pl.Buffered(1))
        return pl.BlockSpec(shape, idx)

    cparams = pltpu.CompilerParams(
        dimension_semantics=("parallel", "parallel"),
        vmem_limit_bytes=64 * 1024 * 1024,
    )

    # ---- kernel 1: LN1 + QKV projection -> (B, H, T, hd) bf16 ----
    qkv_out_shape = tuple(jax.ShapeDtypeStruct((B, n_head, T, hd), jnp.bfloat16)
                          for _ in range(3))
    q, k, v = pl.pallas_call(
        functools.partial(_qkv_kernel, n_head=n_head, scale=scale),
        out_shape=qkv_out_shape,
        grid_spec=pltpu.PrefetchScalarGridSpec(
            num_scalar_prefetch=0,
            grid=(B, nt),
            in_specs=[pl.BlockSpec((1, tq, C), lambda b, t: (b, t, 0)),
                      wspec(p["ln1_g"].shape), wspec(p["ln1_b"].shape),
                      wspec(p["wq"].shape), wspec(p["wk"].shape), wspec(p["wv"].shape),
                      wspec(p["bq"].shape), wspec(p["bk"].shape), wspec(p["bv"].shape)],
            out_specs=tuple(pl.BlockSpec((1, n_head, tq, hd), lambda b, t: (b, 0, t, 0))
                            for _ in range(3)),
        ),
        compiler_params=cparams,
    )(x, p["ln1_g"], p["ln1_b"], p["wq"], p["wk"], p["wv"], p["bq"], p["bk"], p["bv"])

    # ---- kernel 2: attention + proj + residual + LN2 + MLP + residual ----
    out = pl.pallas_call(
        functools.partial(_attn_mlp_kernel, n_head=n_head),
        out_shape=jax.ShapeDtypeStruct((B, T, C), x.dtype),
        grid_spec=pltpu.PrefetchScalarGridSpec(
            num_scalar_prefetch=0,
            grid=(B, nt),
            in_specs=[pl.BlockSpec((1, tq, C), lambda b, t: (b, t, 0)),
                      pl.BlockSpec((1, n_head, tq, hd), lambda b, t: (b, 0, t, 0)),
                      pl.BlockSpec((1, n_head, T, hd), lambda b, t: (b, 0, 0, 0)),
                      pl.BlockSpec((1, n_head, T, hd), lambda b, t: (b, 0, 0, 0)),
                      wspec(p["wproj"].shape), wspec(p["bproj"].shape),
                      wspec(p["ln2_g"].shape), wspec(p["ln2_b"].shape),
                      wspec(p["wfc"].shape), wspec(p["bfc"].shape),
                      wspec(p["wout"].shape), wspec(p["bout"].shape)],
            out_specs=pl.BlockSpec((1, tq, C), lambda b, t: (b, t, 0)),
        ),
        compiler_params=cparams,
    )(x, q, k, v, p["wproj"], p["bproj"], p["ln2_g"], p["ln2_b"],
      p["wfc"], p["bfc"], p["wout"], p["bout"])
    return out


# ---------------------------------------------------------------------------
# Parameters + pure-JAX reference (mirrors the PyTorch forward exactly, f32).
# ---------------------------------------------------------------------------
def init_params(key, n_embd):
    keys = jax.random.split(key, 8)
    s = 0.02
    return {
        "ln1_g": jnp.ones((1, n_embd), jnp.float32),
        "ln1_b": jnp.zeros((1, n_embd), jnp.float32),
        "w_attn": s * jax.random.normal(keys[0], (n_embd, 3 * n_embd), jnp.float32),
        "b_attn": s * jax.random.normal(keys[1], (1, 3 * n_embd), jnp.float32),
        "w_proj": s * jax.random.normal(keys[2], (n_embd, n_embd), jnp.float32),
        "b_proj": s * jax.random.normal(keys[3], (1, n_embd), jnp.float32),
        "ln2_g": jnp.ones((1, n_embd), jnp.float32),
        "ln2_b": jnp.zeros((1, n_embd), jnp.float32),
        "w_fc": s * jax.random.normal(keys[4], (n_embd, 4 * n_embd), jnp.float32),
        "b_fc": s * jax.random.normal(keys[5], (1, 4 * n_embd), jnp.float32),
        "w_out": s * jax.random.normal(keys[6], (4 * n_embd, n_embd), jnp.float32),
        "b_out": s * jax.random.normal(keys[7], (1, n_embd), jnp.float32),
    }


def reference_block(x, p, n_head):
    B, T, C = x.shape
    hd = C // n_head

    def ln(v, g, b):
        mu = jnp.mean(v, -1, keepdims=True)
        var = jnp.mean((v - mu) ** 2, -1, keepdims=True)
        return (v - mu) / jnp.sqrt(var + 1e-5) * g + b

    xn = ln(x, p["ln1_g"], p["ln1_b"])
    qkv = xn @ p["w_attn"] + p["b_attn"]
    q, k, v = jnp.split(qkv, 3, axis=-1)
    q = q.reshape(B, T, n_head, hd).transpose(0, 2, 1, 3)
    k = k.reshape(B, T, n_head, hd).transpose(0, 2, 1, 3)
    v = v.reshape(B, T, n_head, hd).transpose(0, 2, 1, 3)
    att = (q @ k.transpose(0, 1, 3, 2)) / math.sqrt(hd)
    att = jax.nn.softmax(att, axis=-1)
    y = (att @ v).transpose(0, 2, 1, 3).reshape(B, T, C)
    y = y @ p["w_proj"] + p["b_proj"]
    x = x + y
    xn2 = ln(x, p["ln2_g"], p["ln2_b"])
    h = xn2 @ p["w_fc"] + p["b_fc"]
    h = 0.5 * h * (1.0 + jnp.tanh(math.sqrt(2.0 / math.pi) * (h + 0.044715 * h ** 3)))
    x = x + (h @ p["w_out"] + p["b_out"])
    return x


if __name__ == "__main__":
    B, T, C, n_head = 2, 8, 32, 4
    key = jax.random.PRNGKey(0)
    kx, kp = jax.random.split(key)
    x = jax.random.normal(kx, (B, T, C), jnp.float32)
    params = init_params(kp, C)

    try:
        out = jax.block_until_ready(
            noncausal_block(x, params, n_head, single_buffer_weights=True))
    except Exception:
        # Fallback if this JAX build rejects pipeline_mode=pl.Buffered(1) on weight BlockSpecs.
        out = jax.block_until_ready(
            noncausal_block(x, params, n_head, single_buffer_weights=False))

    ref = reference_block(x, params, n_head)
    assert out.shape == (B, T, C)
    max_err = float(jnp.max(jnp.abs(out - ref)))
    assert jnp.allclose(out, ref, atol=2e-2, rtol=2e-2), f"mismatch vs reference (max abs err {max_err})"

    print("KERNEL_OK")
</pallas_src>

<mosaic_0001>
module attributes {stable_mosaic.version = 11 : i64} {
  func.func @_qkv_kernel(%arg0: i32, %arg1: i32, %arg2: memref<1x8x32xf32, #tpu.memory_space<vmem>>, %arg3: memref<1x32xf32, #tpu.memory_space<vmem>>, %arg4: memref<1x32xf32, #tpu.memory_space<vmem>>, %arg5: memref<4x32x8xbf16, #tpu.memory_space<vmem>>, %arg6: memref<4x32x8xbf16, #tpu.memory_space<vmem>>, %arg7: memref<4x32x8xbf16, #tpu.memory_space<vmem>>, %arg8: memref<4x1x8xf32, #tpu.memory_space<vmem>>, %arg9: memref<4x1x8xf32, #tpu.memory_space<vmem>>, %arg10: memref<4x1x8xf32, #tpu.memory_space<vmem>>, %arg11: memref<1x4x8x8xbf16, #tpu.memory_space<vmem>>, %arg12: memref<1x4x8x8xbf16, #tpu.memory_space<vmem>>, %arg13: memref<1x4x8x8xbf16, #tpu.memory_space<vmem>>) attributes {dimension_semantics = [#tpu.dimension_semantics<parallel>, #tpu.dimension_semantics<parallel>], iteration_bounds = array<i64: 2, 1>, scalar_prefetch = 0 : i64, scratch_operands = 0 : i64, tpu.core_type = #tpu.core_type<tc>, window_params = [{transform_indices = @transform_0, window_bounds = array<i64: 1, 8, 32>}, {pipeline_mode = #tpu.pipeline_mode<synchronous>, transform_indices = @transform_1, window_bounds = array<i64: 1, 32>}, {pipeline_mode = #tpu.pipeline_mode<synchronous>, transform_indices = @transform_2, window_bounds = array<i64: 1, 32>}, {pipeline_mode = #tpu.pipeline_mode<synchronous>, transform_indices = @transform_3, window_bounds = array<i64: 4, 32, 8>}, {pipeline_mode = #tpu.pipeline_mode<synchronous>, transform_indices = @transform_4, window_bounds = array<i64: 4, 32, 8>}, {pipeline_mode = #tpu.pipeline_mode<synchronous>, transform_indices = @transform_5, window_bounds = array<i64: 4, 32, 8>}, {pipeline_mode = #tpu.pipeline_mode<synchronous>, transform_indices = @transform_6, window_bounds = array<i64: 4, 1, 8>}, {pipeline_mode = #tpu.pipeline_mode<synchronous>, transform_indices = @transform_7, window_bounds = array<i64: 4, 1, 8>}, {pipeline_mode = #tpu.pipeline_mode<synchronous>, transform_indices = @transform_8, window_bounds = array<i64: 4, 1, 8>}, {transform_indices = @transform_9, window_bounds = array<i64: 1, 4, 8, 8>}, {transform_indices = @transform_10, window_bounds = array<i64: 1, 4, 8, 8>}, {transform_indices = @transform_11, window_bounds = array<i64: 1, 4, 8, 8>}]} {
    %c0 = arith.constant 0 : index
    %c0_0 = arith.constant 0 : index
    %c0_1 = arith.constant 0 : index
    %0 = vector.load %arg2[%c0, %c0_0, %c0_1] : memref<1x8x32xf32, #tpu.memory_space<vmem>>, vector<1x8x32xf32>
    %1 = vector.shape_cast %0 : vector<1x8x32xf32> to vector<8x32xf32>
    %c0_2 = arith.constant 0 : index
    %c0_3 = arith.constant 0 : index
    %2 = vector.load %arg3[%c0_2, %c0_3] : memref<1x32xf32, #tpu.memory_space<vmem>>, vector<1x32xf32>
    %c0_4 = arith.constant 0 : index
    %c0_5 = arith.constant 0 : index
    %3 = vector.load %arg4[%c0_4, %c0_5] : memref<1x32xf32, #tpu.memory_space<vmem>>, vector<1x32xf32>
    %cst = arith.constant dense<0.000000e+00> : vector<8xf32>
    %4 = vector.multi_reduction <add>, %1, %cst [1] : vector<8x32xf32> to vector<8xf32>
    %5 = vector.shape_cast %4 : vector<8xf32> to vector<8x1xf32>
    %cst_6 = arith.constant 3.200000e+01 : f32
    %6 = vector.broadcast %cst_6 : f32 to vector<8x1xf32>
    %7 = arith.divf %5, %6 : vector<8x1xf32>
    %8 = vector.broadcast %7 : vector<8x1xf32> to vector<8x32xf32>
    %9 = arith.subf %1, %8 : vector<8x32xf32>
    %10 = arith.mulf %9, %9 : vector<8x32xf32>
    %cst_7 = arith.constant dense<0.000000e+00> : vector<8xf32>
    %11 = vector.multi_reduction <add>, %10, %cst_7 [1] : vector<8x32xf32> to vector<8xf32>
    %12 = vector.shape_cast %11 : vector<8xf32> to vector<8x1xf32>
    %cst_8 = arith.constant 3.200000e+01 : f32
    %13 = vector.broadcast %cst_8 : f32 to vector<8x1xf32>
    %14 = arith.divf %12, %13 : vector<8x1xf32>
    %15 = vector.broadcast %7 : vector<8x1xf32> to vector<8x32xf32>
    %16 = arith.subf %1, %15 : vector<8x32xf32>
    %cst_9 = arith.constant 9.99999974E-6 : f32
    %17 = vector.broadcast %cst_9 : f32 to vector<8x1xf32>
    %18 = arith.addf %14, %17 : vector<8x1xf32>
    %19 = math.rsqrt %18 : vector<8x1xf32>
    %20 = vector.broadcast %19 : vector<8x1xf32> to vector<8x32xf32>
    %21 = arith.mulf %16, %20 : vector<8x32xf32>
    %22 = vector.broadcast %2 : vector<1x32xf32> to vector<8x32xf32>
    %23 = arith.mulf %21, %22 : vector<8x32xf32>
    %24 = vector.broadcast %3 : vector<1x32xf32> to vector<8x32xf32>
    %25 = arith.addf %23, %24 : vector<8x32xf32>
    %26 = arith.truncf %25 : vector<8x32xf32> to vector<8x32xbf16>
    %c0_10 = arith.constant 0 : index
    %c0_11 = arith.constant 0 : index
    %c0_12 = arith.constant 0 : index
    %27 = vector.load %arg5[%c0_10, %c0_11, %c0_12] : memref<4x32x8xbf16, #tpu.memory_space<vmem>>, vector<1x32x8xbf16>
    %28 = vector.shape_cast %27 : vector<1x32x8xbf16> to vector<32x8xbf16>
    %cst_13 = arith.constant dense<0.000000e+00> : vector<8x8xf32>
    %29 = tpu.matmul %26, %28, %cst_13 {dimension_numbers = #tpu.dot_dimension_numbers<[1], [0], [0], [1], [0, 0, 1, 1], [], []>} : vector<8x32xbf16>, vector<32x8xbf16>, vector<8x8xf32> -> vector<8x8xf32>
    %c0_14 = arith.constant 0 : index
    %c0_15 = arith.constant 0 : index
    %c0_16 = arith.constant 0 : index
    %30 = vector.load %arg8[%c0_14, %c0_15, %c0_16] : memref<4x1x8xf32, #tpu.memory_space<vmem>>, vector<1x1x8xf32>
    %31 = vector.shape_cast %30 : vector<1x1x8xf32> to vector<1x8xf32>
    %32 = vector.broadcast %31 : vector<1x8xf32> to vector<8x8xf32>
    %33 = arith.addf %29, %32 : vector<8x8xf32>
    %c0_17 = arith.constant 0 : index
    %c0_18 = arith.constant 0 : index
    %c0_19 = arith.constant 0 : index
    %34 = vector.load %arg6[%c0_17, %c0_18, %c0_19] : memref<4x32x8xbf16, #tpu.memory_space<vmem>>, vector<1x32x8xbf16>
    %35 = vector.shape_cast %34 : vector<1x32x8xbf16> to vector<32x8xbf16>
    %cst_20 = arith.constant dense<0.000000e+00> : vector<8x8xf32>
    %36 = tpu.matmul %26, %35, %cst_20 {dimension_numbers = #tpu.dot_dimension_numbers<[1], [0], [0], [1], [0, 0, 1, 1], [], []>} : vector<8x32xbf16>, vector<32x8xbf16>, vector<8x8xf32> -> vector<8x8xf32>
    %c0_21 = arith.constant 0 : index
    %c0_22 = arith.constant 0 : index
    %c0_23 = arith.constant 0 : index
    %37 = vector.load %arg9[%c0_21, %c0_22, %c0_23] : memref<4x1x8xf32, #tpu.memory_space<vmem>>, vector<1x1x8xf32>
    %38 = vector.shape_cast %37 : vector<1x1x8xf32> to vector<1x8xf32>
    %39 = vector.broadcast %38 : vector<1x8xf32> to vector<8x8xf32>
    %40 = arith.addf %36, %39 : vector<8x8xf32>
    %c0_24 = arith.constant 0 : index
    %c0_25 = arith.constant 0 : index
    %c0_26 = arith.constant 0 : index
    %41 = vector.load %arg7[%c0_24, %c0_25, %c0_26] : memref<4x32x8xbf16, #tpu.memory_space<vmem>>, vector<1x32x8xbf16>
    %42 = vector.shape_cast %41 : vector<1x32x8xbf16> to vector<32x8xbf16>
    %cst_27 = arith.constant dense<0.000000e+00> : vector<8x8xf32>
    %43 = tpu.matmul %26, %42, %cst_27 {dimension_numbers = #tpu.dot_dimension_numbers<[1], [0], [0], [1], [0, 0, 1, 1], [], []>} : vector<8x32xbf16>, vector<32x8xbf16>, vector<8x8xf32> -> vector<8x8xf32>
    %c0_28 = arith.constant 0 : index
    %c0_29 = arith.constant 0 : index
    %c0_30 = arith.constant 0 : index
    %44 = vector.load %arg10[%c0_28, %c0_29, %c0_30] : memref<4x1x8xf32, #tpu.memory_space<vmem>>, vector<1x1x8xf32>
    %45 = vector.shape_cast %44 : vector<1x1x8xf32> to vector<1x8xf32>
    %46 = vector.broadcast %45 : vector<1x8xf32> to vector<8x8xf32>
    %47 = arith.addf %43, %46 : vector<8x8xf32>
    %cst_31 = arith.constant 0.353553385 : f32
    %48 = vector.broadcast %cst_31 : f32 to vector<8x8xf32>
    %49 = arith.mulf %33, %48 : vector<8x8xf32>
    %50 = arith.truncf %49 : vector<8x8xf32> to vector<8x8xbf16>
    %c0_32 = arith.constant 0 : index
    %c0_33 = arith.constant 0 : index
    %c0_34 = arith.constant 0 : index
    %c0_35 = arith.constant 0 : index
    %51 = vector.load %arg11[%c0_32, %c0_33, %c0_34, %c0_35] : memref<1x4x8x8xbf16, #tpu.memory_space<vmem>>, vector<1x1x8x8xbf16>
    %52 = vector.shape_cast %51 : vector<1x1x8x8xbf16> to vector<8x8xbf16>
    %53 = vector.shape_cast %50 : vector<8x8xbf16> to vector<1x1x8x8xbf16>
    tpu.vector_store %arg11[%c0_32, %c0_33, %c0_34, %c0_35], %53 {strides = array<i32>} : memref<1x4x8x8xbf16, #tpu.memory_space<vmem>>, vector<1x1x8x8xbf16>,
    %54 = arith.truncf %40 : vector<8x8xf32> to vector<8x8xbf16>
    %c0_36 = arith.constant 0 : index
    %c0_37 = arith.constant 0 : index
    %c0_38 = arith.constant 0 : index
    %c0_39 = arith.constant 0 : index
    %55 = vector.load %arg12[%c0_36, %c0_37, %c0_38, %c0_39] : memref<1x4x8x8xbf16, #tpu.memory_space<vmem>>, vector<1x1x8x8xbf16>
    %56 = vector.shape_cast %55 : vector<1x1x8x8xbf16> to vector<8x8xbf16>
    %57 = vector.shape_cast %54 : vector<8x8xbf16> to vector<1x1x8x8xbf16>
    tpu.vector_store %arg12[%c0_36, %c0_37, %c0_38, %c0_39], %57 {strides = array<i32>} : memref<1x4x8x8xbf16, #tpu.memory_space<vmem>>, vector<1x1x8x8xbf16>,
    %58 = arith.truncf %47 : vector<8x8xf32> to vector<8x8xbf16>
    %c0_40 = arith.constant 0 : index
    %c0_41 = arith.constant 0 : index
    %c0_42 = arith.constant 0 : index
    %c0_43 = arith.constant 0 : index
    %59 = vector.load %arg13[%c0_40, %c0_41, %c0_42, %c0_43] : memref<1x4x8x8xbf16, #tpu.memory_space<vmem>>, vector<1x1x8x8xbf16>
    %60 = vector.shape_cast %59 : vector<1x1x8x8xbf16> to vector<8x8xbf16>
    %61 = vector.shape_cast %58 : vector<8x8xbf16> to vector<1x1x8x8xbf16>
    tpu.vector_store %arg13[%c0_40, %c0_41, %c0_42, %c0_43], %61 {strides = array<i32>} : memref<1x4x8x8xbf16, #tpu.memory_space<vmem>>, vector<1x1x8x8xbf16>,
    %c1 = arith.constant 1 : index
    %c0_44 = arith.constant 0 : index
    %c0_45 = arith.constant 0 : index
    %62 = vector.load %arg5[%c1, %c0_44, %c0_45] : memref<4x32x8xbf16, #tpu.memory_space<vmem>>, vector<1x32x8xbf16>
    %63 = vector.shape_cast %62 : vector<1x32x8xbf16> to vector<32x8xbf16>
    %cst_46 = arith.constant dense<0.000000e+00> : vector<8x8xf32>
    %64 = tpu.matmul %26, %63, %cst_46 {dimension_numbers = #tpu.dot_dimension_numbers<[1], [0], [0], [1], [0, 0, 1, 1], [], []>} : vector<8x32xbf16>, vector<32x8xbf16>, vector<8x8xf32> -> vector<8x8xf32>
    %c1_47 = arith.constant 1 : index
    %c0_48 = arith.constant 0 : index
    %c0_49 = arith.constant 0 : index
    %65 = vector.load %arg8[%c1_47, %c0_48, %c0_49] : memref<4x1x8xf32, #tpu.memory_space<vmem>>, vector<1x1x8xf32>
    %66 = vector.shape_cast %65 : vector<1x1x8xf32> to vector<1x8xf32>
    %67 = vector.broadcast %66 : vector<1x8xf32> to vector<8x8xf32>
    %68 = arith.addf %64, %67 : vector<8x8xf32>
    %c1_50 = arith.constant 1 : index
    %c0_51 = arith.constant 0 : index
    %c0_52 = arith.constant 0 : index
    %69 = vector.load %arg6[%c1_50, %c0_51, %c0_52] : memref<4x32x8xbf16, #tpu.memory_space<vmem>>, vector<1x32x8xbf16>
    %70 = vector.shape_cast %69 : vector<1x32x8xbf16> to vector<32x8xbf16>
    %cst_53 = arith.constant dense<0.000000e+00> : vector<8x8xf32>
    %71 = tpu.matmul %26, %70, %cst_53 {dimension_numbers = #tpu.dot_dimension_numbers<[1], [0], [0], [1], [0, 0, 1, 1], [], []>} : vector<8x32xbf16>, vector<32x8xbf16>, vector<8x8xf32> -> vector<8x8xf32>
    %c1_54 = arith.constant 1 : index
    %c0_55 = arith.constant 0 : index
    %c0_56 = arith.constant 0 : index
    %72 = vector.load %arg9[%c1_54, %c0_55, %c0_56] : memref<4x1x8xf32, #tpu.memory_space<vmem>>, vector<1x1x8xf32>
    %73 = vector.shape_cast %72 : vector<1x1x8xf32> to vector<1x8xf32>
    %74 = vector.broadcast %73 : vector<1x8xf32> to vector<8x8xf32>
    %75 = arith.addf %71, %74 : vector<8x8xf32>
    %c1_57 = arith.constant 1 : index
    %c0_58 = arith.constant 0 : index
    %c0_59 = arith.constant 0 : index
    %76 = vector.load %arg7[%c1_57, %c0_58, %c0_59] : memref<4x32x8xbf16, #tpu.memory_space<vmem>>, vector<1x32x8xbf16>
    %77 = vector.shape_cast %76 : vector<1x32x8xbf16> to vector<32x8xbf16>
    %cst_60 = arith.constant dense<0.000000e+00> : vector<8x8xf32>
    %78 = tpu.matmul %26, %77, %cst_60 {dimension_numbers = #tpu.dot_dimension_numbers<[1], [0], [0], [1], [0, 0, 1, 1], [], []>} : vector<8x32xbf16>, vector<32x8xbf16>, vector<8x8xf32> -> vector<8x8xf32>
    %c1_61 = arith.constant 1 : index
    %c0_62 = arith.constant 0 : index
    %c0_63 = arith.constant 0 : index
    %79 = vector.load %arg10[%c1_61, %c0_62, %c0_63] : memref<4x1x8xf32, #tpu.memory_space<vmem>>, vector<1x1x8xf32>
    %80 = vector.shape_cast %79 : vector<1x1x8xf32> to vector<1x8xf32>
    %81 = vector.broadcast %80 : vector<1x8xf32> to vector<8x8xf32>
    %82 = arith.addf %78, %81 : vector<8x8xf32>
    %cst_64 = arith.constant 0.353553385 : f32
    %83 = vector.broadcast %cst_64 : f32 to vector<8x8xf32>
    %84 = arith.mulf %68, %83 : vector<8x8xf32>
    %85 = arith.truncf %84 : vector<8x8xf32> to vector<8x8xbf16>
    %c0_65 = arith.constant 0 : index
    %c1_66 = arith.constant 1 : index
    %c0_67 = arith.constant 0 : index
    %c0_68 = arith.constant 0 : index
    %86 = vector.load %arg11[%c0_65, %c1_66, %c0_67, %c0_68] : memref<1x4x8x8xbf16, #tpu.memory_space<vmem>>, vector<1x1x8x8xbf16>
    %87 = vector.shape_cast %86 : vector<1x1x8x8xbf16> to vector<8x8xbf16>
    %88 = vector.shape_cast %85 : vector<8x8xbf16> to vector<1x1x8x8xbf16>
    tpu.vector_store %arg11[%c0_65, %c1_66, %c0_67, %c0_68], %88 {strides = array<i32>} : memref<1x4x8x8xbf16, #tpu.memory_space<vmem>>, vector<1x1x8x8xbf16>,
    %89 = arith.truncf %75 : vector<8x8xf32> to vector<8x8xbf16>
    %c0_69 = arith.constant 0 : index
    %c1_70 = arith.constant 1 : index
    %c0_71 = arith.constant 0 : index
    %c0_72 = arith.constant 0 : index
    %90 = vector.load %arg12[%c0_69, %c1_70, %c0_71, %c0_72] : memref<1x4x8x8xbf16, #tpu.memory_space<vmem>>, vector<1x1x8x8xbf16>
    %91 = vector.shape_cast %90 : vector<1x1x8x8xbf16> to vector<8x8xbf16>
    %92 = vector.shape_cast %89 : vector<8x8xbf16> to vector<1x1x8x8xbf16>
    tpu.vector_store %arg12[%c0_69, %c1_70, %c0_71, %c0_72], %92 {strides = array<i32>} : memref<1x4x8x8xbf16, #tpu.memory_space<vmem>>, vector<1x1x8x8xbf16>,
    %93 = arith.truncf %82 : vector<8x8xf32> to vector<8x8xbf16>
    %c0_73 = arith.constant 0 : index
    %c1_74 = arith.constant 1 : index
    %c0_75 = arith.constant 0 : index
    %c0_76 = arith.constant 0 : index
    %94 = vector.load %arg13[%c0_73, %c1_74, %c0_75, %c0_76] : memref<1x4x8x8xbf16, #tpu.memory_space<vmem>>, vector<1x1x8x8xbf16>
    %95 = vector.shape_cast %94 : vector<1x1x8x8xbf16> to vector<8x8xbf16>
    %96 = vector.shape_cast %93 : vector<8x8xbf16> to vector<1x1x8x8xbf16>
    tpu.vector_store %arg13[%c0_73, %c1_74, %c0_75, %c0_76], %96 {strides = array<i32>} : memref<1x4x8x8xbf16, #tpu.memory_space<vmem>>, vector<1x1x8x8xbf16>,
    %c2 = arith.constant 2 : index
    %c0_77 = arith.constant 0 : index
    %c0_78 = arith.constant 0 : index
    %97 = vector.load %arg5[%c2, %c0_77, %c0_78] : memref<4x32x8xbf16, #tpu.memory_space<vmem>>, vector<1x32x8xbf16>
    %98 = vector.shape_cast %97 : vector<1x32x8xbf16> to vector<32x8xbf16>
    %cst_79 = arith.constant dense<0.000000e+00> : vector<8x8xf32>
    %99 = tpu.matmul %26, %98, %cst_79 {dimension_numbers = #tpu.dot_dimension_numbers<[1], [0], [0], [1], [0, 0, 1, 1], [], []>} : vector<8x32xbf16>, vector<32x8xbf16>, vector<8x8xf32> -> vector<8x8xf32>
    %c2_80 = arith.constant 2 : index
    %c0_81 = arith.constant 0 : index
    %c0_82 = arith.constant 0 : index
    %100 = vector.load %arg8[%c2_80, %c0_81, %c0_82] : memref<4x1x8xf32, #tpu.memory_space<vmem>>, vector<1x1x8xf32>
    %101 = vector.shape_cast %100 : vector<1x1x8xf32> to vector<1x8xf32>
    %102 = vector.broadcast %101 : vector<1x8xf32> to vector<8x8xf32>
    %103 = arith.addf %99, %102 : vector<8x8xf32>
    %c2_83 = arith.constant 2 : index
    %c0_84 = arith.constant 0 : index
    %c0_85 = arith.constant 0 : index
    %104 = vector.load %arg6[%c2_83, %c0_84, %c0_85] : memref<4x32x8xbf16, #tpu.memory_space<vmem>>, vector<1x32x8xbf16>
    %105 = vector.shape_cast %104 : vector<1x32x8xbf16> to vector<32x8xbf16>
    %cst_86 = arith.constant dense<0.000000e+00> : vector<8x8xf32>
    %106 = tpu.matmul %26, %105, %cst_86 {dimension_numbers = #tpu.dot_dimension_numbers<[1], [0], [0], [1], [0, 0, 1, 1], [], []>} : vector<8x32xbf16>, vector<32x8xbf16>, vector<8x8xf32> -> vector<8x8xf32>
    %c2_87 = arith.constant 2 : index
    %c0_88 = arith.constant 0 : index
    %c0_89 = arith.constant 0 : index
    %107 = vector.load %arg9[%c2_87, %c0_88, %c0_89] : memref<4x1x8xf32, #tpu.memory_space<vmem>>, vector<1x1x8xf32>
    %108 = vector.shape_cast %107 : vector<1x1x8xf32> to vector<1x8xf32>
    %109 = vector.broadcast %108 : vector<1x8xf32> to vector<8x8xf32>
    %110 = arith.addf %106, %109 : vector<8x8xf32>
    %c2_90 = arith.constant 2 : index
    %c0_91 = arith.constant 0 : index
    %c0_92 = arith.constant 0 : index
    %111 = vector.load %arg7[%c2_90, %c0_91, %c0_92] : memref<4x32x8xbf16, #tpu.memory_space<vmem>>, vector<1x32x8xbf16>
    %112 = vector.shape_cast %111 : vector<1x32x8xbf16> to vector<32x8xbf16>
    %cst_93 = arith.constant dense<0.000000e+00> : vector<8x8xf32>
    %113 = tpu.matmul %26, %112, %cst_93 {dimension_numbers = #tpu.dot_dimension_numbers<[1], [0], [0], [1], [0, 0, 1, 1], [], []>} : vector<8x32xbf16>, vector<32x8xbf16>, vector<8x8xf32> -> vector<8x8xf32>
    %c2_94 = arith.constant 2 : index
    %c0_95 = arith.constant 0 : index
    %c0_96 = arith.constant 0 : index
    %114 = vector.load %arg10[%c2_94, %c0_95, %c0_96] : memref<4x1x8xf32, #tpu.memory_space<vmem>>, vector<1x1x8xf32>
    %115 = vector.shape_cast %114 : vector<1x1x8xf32> to vector<1x8xf32>
    %116 = vector.broadcast %115 : vector<1x8xf32> to vector<8x8xf32>
    %117 = arith.addf %113, %116 : vector<8x8xf32>
    %cst_97 = arith.constant 0.353553385 : f32
    %118 = vector.broadcast %cst_97 : f32 to vector<8x8xf32>
    %119 = arith.mulf %103, %118 : vector<8x8xf32>
    %120 = arith.truncf %119 : vector<8x8xf32> to vector<8x8xbf16>
    %c0_98 = arith.constant 0 : index
    %c2_99 = arith.constant 2 : index
    %c0_100 = arith.constant 0 : index
    %c0_101 = arith.constant 0 : index
    %121 = vector.load %arg11[%c0_98, %c2_99, %c0_100, %c0_101] : memref<1x4x8x8xbf16, #tpu.memory_space<vmem>>, vector<1x1x8x8xbf16>
    %122 = vector.shape_cast %121 : vector<1x1x8x8xbf16> to vector<8x8xbf16>
    %123 = vector.shape_cast %120 : vector<8x8xbf16> to vector<1x1x8x8xbf16>
    tpu.vector_store %arg11[%c0_98, %c2_99, %c0_100, %c0_101], %123 {strides = array<i32>} : memref<1x4x8x8xbf16, #tpu.memory_space<vmem>>, vector<1x1x8x8xbf16>,
    %124 = arith.truncf %110 : vector<8x8xf32> to vector<8x8xbf16>
    %c0_102 = arith.constant 0 : index
    %c2_103 = arith.constant 2 : index
    %c0_104 = arith.constant 0 : index
    %c0_105 = arith.constant 0 : index
    %125 = vector.load %arg12[%c0_102, %c2_103, %c0_104, %c0_105] : memref<1x4x8x8xbf16, #tpu.memory_space<vmem>>, vector<1x1x8x8xbf16>
    %126 = vector.shape_cast %125 : vector<1x1x8x8xbf16> to vector<8x8xbf16>
    %127 = vector.shape_cast %124 : vector<8x8xbf16> to vector<1x1x8x8xbf16>
    tpu.vector_store %arg12[%c0_102, %c2_103, %c0_104, %c0_105], %127 {strides = array<i32>} : memref<1x4x8x8xbf16, #tpu.memory_space<vmem>>, vector<1x1x8x8xbf16>,
    %128 = arith.truncf %117 : vector<8x8xf32> to vector<8x8xbf16>
    %c0_106 = arith.constant 0 : index
    %c2_107 = arith.constant 2 : index
    %c0_108 = arith.constant 0 : index
    %c0_109 = arith.constant 0 : index
    %129 = vector.load %arg13[%c0_106, %c2_107, %c0_108, %c0_109] : memref<1x4x8x8xbf16, #tpu.memory_space<vmem>>, vector<1x1x8x8xbf16>
    %130 = vector.shape_cast %129 : vector<1x1x8x8xbf16> to vector<8x8xbf16>
    %131 = vector.shape_cast %128 : vector<8x8xbf16> to vector<1x1x8x8xbf16>
    tpu.vector_store %arg13[%c0_106, %c2_107, %c0_108, %c0_109], %131 {strides = array<i32>} : memref<1x4x8x8xbf16, #tpu.memory_space<vmem>>, vector<1x1x8x8xbf16>,
    %c3 = arith.constant 3 : index
    %c0_110 = arith.constant 0 : index
    %c0_111 = arith.constant 0 : index
    %132 = vector.load %arg5[%c3, %c0_110, %c0_111] : memref<4x32x8xbf16, #tpu.memory_space<vmem>>, vector<1x32x8xbf16>
    %133 = vector.shape_cast %132 : vector<1x32x8xbf16> to vector<32x8xbf16>
    %cst_112 = arith.constant dense<0.000000e+00> : vector<8x8xf32>
    %134 = tpu.matmul %26, %133, %cst_112 {dimension_numbers = #tpu.dot_dimension_numbers<[1], [0], [0], [1], [0, 0, 1, 1], [], []>} : vector<8x32xbf16>, vector<32x8xbf16>, vector<8x8xf32> -> vector<8x8xf32>
    %c3_113 = arith.constant 3 : index
    %c0_114 = arith.constant 0 : index
    %c0_115 = arith.constant 0 : index
    %135 = vector.load %arg8[%c3_113, %c0_114, %c0_115] : memref<4x1x8xf32, #tpu.memory_space<vmem>>, vector<1x1x8xf32>
    %136 = vector.shape_cast %135 : vector<1x1x8xf32> to vector<1x8xf32>
    %137 = vector.broadcast %136 : vector<1x8xf32> to vector<8x8xf32>
    %138 = arith.addf %134, %137 : vector<8x8xf32>
    %c3_116 = arith.constant 3 : index
    %c0_117 = arith.constant 0 : index
    %c0_118 = arith.constant 0 : index
    %139 = vector.load %arg6[%c3_116, %c0_117, %c0_118] : memref<4x32x8xbf16, #tpu.memory_space<vmem>>, vector<1x32x8xbf16>
    %140 = vector.shape_cast %139 : vector<1x32x8xbf16> to vector<32x8xbf16>
    %cst_119 = arith.constant dense<0.000000e+00> : vector<8x8xf32>
    %141 = tpu.matmul %26, %140, %cst_119 {dimension_numbers = #tpu.dot_dimension_numbers<[1], [0], [0], [1], [0, 0, 1, 1], [], []>} : vector<8x32xbf16>, vector<32x8xbf16>, vector<8x8xf32> -> vector<8x8xf32>
    %c3_120 = arith.constant 3 : index
    %c0_121 = arith.constant 0 : index
    %c0_122 = arith.constant 0 : index
    %142 = vector.load %arg9[%c3_120, %c0_121, %c0_122] : memref<4x1x8xf32, #tpu.memory_space<vmem>>, vector<1x1x8xf32>
    %143 = vector.shape_cast %142 : vector<1x1x8xf32> to vector<1x8xf32>
    %144 = vector.broadcast %143 : vector<1x8xf32> to vector<8x8xf32>
    %145 = arith.addf %141, %144 : vector<8x8xf32>
    %c3_123 = arith.constant 3 : index
    %c0_124 = arith.constant 0 : index
    %c0_125 = arith.constant 0 : index
    %146 = vector.load %arg7[%c3_123, %c0_124, %c0_125] : memref<4x32x8xbf16, #tpu.memory_space<vmem>>, vector<1x32x8xbf16>
    %147 = vector.shape_cast %146 : vector<1x32x8xbf16> to vector<32x8xbf16>
    %cst_126 = arith.constant dense<0.000000e+00> : vector<8x8xf32>
    %148 = tpu.matmul %26, %147, %cst_126 {dimension_numbers = #tpu.dot_dimension_numbers<[1], [0], [0], [1], [0, 0, 1, 1], [], []>} : vector<8x32xbf16>, vector<32x8xbf16>, vector<8x8xf32> -> vector<8x8xf32>
    %c3_127 = arith.constant 3 : index
    %c0_128 = arith.constant 0 : index
    %c0_129 = arith.constant 0 : index
    %149 = vector.load %arg10[%c3_127, %c0_128, %c0_129] : memref<4x1x8xf32, #tpu.memory_space<vmem>>, vector<1x1x8xf32>
    %150 = vector.shape_cast %149 : vector<1x1x8xf32> to vector<1x8xf32>
    %151 = vector.broadcast %150 : vector<1x8xf32> to vector<8x8xf32>
    %152 = arith.addf %148, %151 : vector<8x8xf32>
    %cst_130 = arith.constant 0.353553385 : f32
    %153 = vector.broadcast %cst_130 : f32 to vector<8x8xf32>
    %154 = arith.mulf %138, %153 : vector<8x8xf32>
    %155 = arith.truncf %154 : vector<8x8xf32> to vector<8x8xbf16>
    %c0_131 = arith.constant 0 : index
    %c3_132 = arith.constant 3 : index
    %c0_133 = arith.constant 0 : index
    %c0_134 = arith.constant 0 : index
    %156 = vector.load %arg11[%c0_131, %c3_132, %c0_133, %c0_134] : memref<1x4x8x8xbf16, #tpu.memory_space<vmem>>, vector<1x1x8x8xbf16>
    %157 = vector.shape_cast %156 : vector<1x1x8x8xbf16> to vector<8x8xbf16>
    %158 = vector.shape_cast %155 : vector<8x8xbf16> to vector<1x1x8x8xbf16>
    tpu.vector_store %arg11[%c0_131, %c3_132, %c0_133, %c0_134], %158 {strides = array<i32>} : memref<1x4x8x8xbf16, #tpu.memory_space<vmem>>, vector<1x1x8x8xbf16>,
    %159 = arith.truncf %145 : vector<8x8xf32> to vector<8x8xbf16>
    %c0_135 = arith.constant 0 : index
    %c3_136 = arith.constant 3 : index
    %c0_137 = arith.constant 0 : index
    %c0_138 = arith.constant 0 : index
    %160 = vector.load %arg12[%c0_135, %c3_136, %c0_137, %c0_138] : memref<1x4x8x8xbf16, #tpu.memory_space<vmem>>, vector<1x1x8x8xbf16>
    %161 = vector.shape_cast %160 : vector<1x1x8x8xbf16> to vector<8x8xbf16>
    %162 = vector.shape_cast %159 : vector<8x8xbf16> to vector<1x1x8x8xbf16>
    tpu.vector_store %arg12[%c0_135, %c3_136, %c0_137, %c0_138], %162 {strides = array<i32>} : memref<1x4x8x8xbf16, #tpu.memory_space<vmem>>, vector<1x1x8x8xbf16>,
    %163 = arith.truncf %152 : vector<8x8xf32> to vector<8x8xbf16>
    %c0_139 = arith.constant 0 : index
    %c3_140 = arith.constant 3 : index
    %c0_141 = arith.constant 0 : index
    %c0_142 = arith.constant 0 : index
    %164 = vector.load %arg13[%c0_139, %c3_140, %c0_141, %c0_142] : memref<1x4x8x8xbf16, #tpu.memory_space<vmem>>, vector<1x1x8x8xbf16>
    %165 = vector.shape_cast %164 : vector<1x1x8x8xbf16> to vector<8x8xbf16>
    %166 = vector.shape_cast %163 : vector<8x8xbf16> to vector<1x1x8x8xbf16>
    tpu.vector_store %arg13[%c0_139, %c3_140, %c0_141, %c0_142], %166 {strides = array<i32>} : memref<1x4x8x8xbf16, #tpu.memory_space<vmem>>, vector<1x1x8x8xbf16>,
    return
  }
  func.func @transform_0(%arg0: i32, %arg1: i32) -> (i32, i32, i32) {
    %c0_i32 = arith.constant 0 : i32
    %c0_i32_0 = arith.constant 0 : i32
    return %arg0, %arg1, %c0_i32 : i32, i32, i32
  }
  func.func @transform_1(%arg0: i32, %arg1: i32) -> (i32, i32) {
    %c0_i32 = arith.constant 0 : i32
    %c0_i32_0 = arith.constant 0 : i32
    %c0_i32_1 = arith.constant 0 : i32
    return %c0_i32, %c0_i32_0 : i32, i32
  }
  func.func @transform_2(%arg0: i32, %arg1: i32) -> (i32, i32) {
    %c0_i32 = arith.constant 0 : i32
    %c0_i32_0 = arith.constant 0 : i32
    %c0_i32_1 = arith.constant 0 : i32
    return %c0_i32, %c0_i32_0 : i32, i32
  }
  func.func @transform_3(%arg0: i32, %arg1: i32) -> (i32, i32, i32) {
    %c0_i32 = arith.constant 0 : i32
    %c0_i32_0 = arith.constant 0 : i32
    %c0_i32_1 = arith.constant 0 : i32
    %c0_i32_2 = arith.constant 0 : i32
    return %c0_i32, %c0_i32_0, %c0_i32_1 : i32, i32, i32
  }
  func.func @transform_4(%arg0: i32, %arg1: i32) -> (i32, i32, i32) {
    %c0_i32 = arith.constant 0 : i32
    %c0_i32_0 = arith.constant 0 : i32
    %c0_i32_1 = arith.constant 0 : i32
    %c0_i32_2 = arith.constant 0 : i32
    return %c0_i32, %c0_i32_0, %c0_i32_1 : i32, i32, i32
  }
  func.func @transform_5(%arg0: i32, %arg1: i32) -> (i32, i32, i32) {
    %c0_i32 = arith.constant 0 : i32
    %c0_i32_0 = arith.constant 0 : i32
    %c0_i32_1 = arith.constant 0 : i32
    %c0_i32_2 = arith.constant 0 : i32
    return %c0_i32, %c0_i32_0, %c0_i32_1 : i32, i32, i32
  }
  func.func @transform_6(%arg0: i32, %arg1: i32) -> (i32, i32, i32) {
    %c0_i32 = arith.constant 0 : i32
    %c0_i32_0 = arith.constant 0 : i32
    %c0_i32_1 = arith.constant 0 : i32
    %c0_i32_2 = arith.constant 0 : i32
    return %c0_i32, %c0_i32_0, %c0_i32_1 : i32, i32, i32
  }
  func.func @transform_7(%arg0: i32, %arg1: i32) -> (i32, i32, i32) {
    %c0_i32 = arith.constant 0 : i32
    %c0_i32_0 = arith.constant 0 : i32
    %c0_i32_1 = arith.constant 0 : i32
    %c0_i32_2 = arith.constant 0 : i32
    return %c0_i32, %c0_i32_0, %c0_i32_1 : i32, i32, i32
  }
  func.func @transform_8(%arg0: i32, %arg1: i32) -> (i32, i32, i32) {
    %c0_i32 = arith.constant 0 : i32
    %c0_i32_0 = arith.constant 0 : i32
    %c0_i32_1 = arith.constant 0 : i32
    %c0_i32_2 = arith.constant 0 : i32
    return %c0_i32, %c0_i32_0, %c0_i32_1 : i32, i32, i32
  }
  func.func @transform_9(%arg0: i32, %arg1: i32) -> (i32, i32, i32, i32) {
    %c0_i32 = arith.constant 0 : i32
    %c0_i32_0 = arith.constant 0 : i32
    %c0_i32_1 = arith.constant 0 : i32
    return %arg0, %c0_i32, %arg1, %c0_i32_0 : i32, i32, i32, i32
  }
  func.func @transform_10(%arg0: i32, %arg1: i32) -> (i32, i32, i32, i32) {
    %c0_i32 = arith.constant 0 : i32
    %c0_i32_0 = arith.constant 0 : i32
    %c0_i32_1 = arith.constant 0 : i32
    return %arg0, %c0_i32, %arg1, %c0_i32_0 : i32, i32, i32, i32
  }
  func.func @transform_11(%arg0: i32, %arg1: i32) -> (i32, i32, i32, i32) {
    %c0_i32 = arith.constant 0 : i32
    %c0_i32_0 = arith.constant 0 : i32
    %c0_i32_1 = arith.constant 0 : i32
    return %arg0, %c0_i32, %arg1, %c0_i32_0 : i32, i32, i32, i32
  }
}

module attributes {stable_mosaic.version = 11 : i64} {
  func.func @_qkv_kernel(%arg0: i32, %arg1: i32, %arg2: memref<1x8x32xf32, #tpu.memory_space<vmem>>, %arg3: memref<1x32xf32, #tpu.memory_space<vmem>>, %arg4: memref<1x32xf32, #tpu.memory_space<vmem>>, %arg5: memref<4x32x8xbf16, #tpu.memory_space<vmem>>, %arg6: memref<4x32x8xbf16, #tpu.memory_space<vmem>>, %arg7: memref<4x32x8xbf16, #tpu.memory_space<vmem>>, %arg8: memref<4x1x8xf32, #tpu.memory_space<vmem>>, %arg9: memref<4x1x8xf32, #tpu.memory_space<vmem>>, %arg10: memref<4x1x8xf32, #tpu.memory_space<vmem>>, %arg11: memref<1x4x8x8xbf16, #tpu.memory_space<vmem>>, %arg12: memref<1x4x8x8xbf16, #tpu.memory_space<vmem>>, %arg13: memref<1x4x8x8xbf16, #tpu.memory_space<vmem>>) attributes {dimension_semantics = [#tpu.dimension_semantics<parallel>, #tpu.dimension_semantics<parallel>], iteration_bounds = array<i64: 2, 1>, scalar_prefetch = 0 : i64, scratch_operands = 0 : i64, tpu.core_type = #tpu.core_type<tc>, window_params = [{transform_indices = @transform_0, window_bounds = array<i64: 1, 8, 32>}, {pipeline_mode = #tpu.pipeline_mode<synchronous>, transform_indices = @transform_1, window_bounds = array<i64: 1, 32>}, {pipeline_mode = #tpu.pipeline_mode<synchronous>, transform_indices = @transform_2, window_bounds = array<i64: 1, 32>}, {pipeline_mode = #tpu.pipeline_mode<synchronous>, transform_indices = @transform_3, window_bounds = array<i64: 4, 32, 8>}, {pipeline_mode = #tpu.pipeline_mode<synchronous>, transform_indices = @transform_4, window_bounds = array<i64: 4, 32, 8>}, {pipeline_mode = #tpu.pipeline_mode<synchronous>, transform_indices = @transform_5, window_bounds = array<i64: 4, 32, 8>}, {pipeline_mode = #tpu.pipeline_mode<synchronous>, transform_indices = @transform_6, window_bounds = array<i64: 4, 1, 8>}, {pipeline_mode = #tpu.pipeline_mode<synchronous>, transform_indices = @transform_7, window_bounds = array<i64: 4, 1, 8>}, {pipeline_mode = #tpu.pipeline_mode<synchronous>, transform_indices = @transform_8, window_bounds = array<i64: 4, 1, 8>}, {transform_indices = @transform_9, window_bounds = array<i64: 1, 4, 8, 8>}, {transform_indices = @transform_10, window_bounds = array<i64: 1, 4, 8, 8>}, {transform_indices = @transform_11, window_bounds = array<i64: 1, 4, 8, 8>}]} {
    %c0 = arith.constant 0 : index
    %c0_0 = arith.constant 0 : index
    %c0_1 = arith.constant 0 : index
    %0 = vector.load %arg2[%c0, %c0_0, %c0_1] : memref<1x8x32xf32, #tpu.memory_space<vmem>>, vector<1x8x32xf32>
    %1 = vector.shape_cast %0 : vector<1x8x32xf32> to vector<8x32xf32>
    %c0_2 = arith.constant 0 : index
    %c0_3 = arith.constant 0 : index
    %2 = vector.load %arg3[%c0_2, %c0_3] : memref<1x32xf32, #tpu.memory_space<vmem>>, vector<1x32xf32>
    %c0_4 = arith.constant 0 : index
    %c0_5 = arith.constant 0 : index
    %3 = vector.load %arg4[%c0_4, %c0_5] : memref<1x32xf32, #tpu.memory_space<vmem>>, vector<1x32xf32>
    %cst = arith.constant dense<0.000000e+00> : vector<8xf32>
    %4 = vector.multi_reduction <add>, %1, %cst [1] : vector<8x32xf32> to vector<8xf32>
    %5 = vector.shape_cast %4 : vector<8xf32> to vector<8x1xf32>
    %cst_6 = arith.constant 3.200000e+01 : f32
    %6 = vector.broadcast %cst_6 : f32 to vector<8x1xf32>
    %7 = arith.divf %5, %6 : vector<8x1xf32>
    %8 = vector.broadcast %7 : vector<8x1xf32> to vector<8x32xf32>
    %9 = arith.subf %1, %8 : vector<8x32xf32>
    %10 = arith.mulf %9, %9 : vector<8x32xf32>
    %cst_7 = arith.constant dense<0.000000e+00> : vector<8xf32>
    %11 = vector.multi_reduction <add>, %10, %cst_7 [1] : vector<8x32xf32> to vector<8xf32>
    %12 = vector.shape_cast %11 : vector<8xf32> to vector<8x1xf32>
    %cst_8 = arith.constant 3.200000e+01 : f32
    %13 = vector.broadcast %cst_8 : f32 to vector<8x1xf32>
    %14 = arith.divf %12, %13 : vector<8x1xf32>
    %15 = vector.broadcast %7 : vector<8x1xf32> to vector<8x32xf32>
    %16 = arith.subf %1, %15 : vector<8x32xf32>
    %cst_9 = arith.constant 9.99999974E-6 : f32
    %17 = vector.broadcast %cst_9 : f32 to vector<8x1xf32>
    %18 = arith.addf %14, %17 : vector<8x1xf32>
    %19 = math.rsqrt %18 : vector<8x1xf32>
    %20 = vector.broadcast %19 : vector<8x1xf32> to vector<8x32xf32>
    %21 = arith.mulf %16, %20 : vector<8x32xf32>
    %22 = vector.broadcast %2 : vector<1x32xf32> to vector<8x32xf32>
    %23 = arith.mulf %21, %22 : vector<8x32xf32>
    %24 = vector.broadcast %3 : vector<1x32xf32> to vector<8x32xf32>
    %25 = arith.addf %23, %24 : vector<8x32xf32>
    %26 = arith.truncf %25 : vector<8x32xf32> to vector<8x32xbf16>
    %c0_10 = arith.constant 0 : index
    %c0_11 = arith.constant 0 : index
    %c0_12 = arith.constant 0 : index
    %27 = vector.load %arg5[%c0_10, %c0_11, %c0_12] : memref<4x32x8xbf16, #tpu.memory_space<vmem>>, vector<1x32x8xbf16>
    %28 = vector.shape_cast %27 : vector<1x32x8xbf16> to vector<32x8xbf16>
    %cst_13 = arith.constant dense<0.000000e+00> : vector<8x8xf32>
    %29 = tpu.matmul %26, %28, %cst_13 {dimension_numbers = #tpu.dot_dimension_numbers<[1], [0], [0], [1], [0, 0, 1, 1], [], []>} : vector<8x32xbf16>, vector<32x8xbf16>, vector<8x8xf32> -> vector<8x8xf32>
    %c0_14 = arith.constant 0 : index
    %c0_15 = arith.constant 0 : index
    %c0_16 = arith.constant 0 : index
    %30 = vector.load %arg8[%c0_14, %c0_15, %c0_16] : memref<4x1x8xf32, #tpu.memory_space<vmem>>, vector<1x1x8xf32>
    %31 = vector.shape_cast %30 : vector<1x1x8xf32> to vector<1x8xf32>
    %32 = vector.broadcast %31 : vector<1x8xf32> to vector<8x8xf32>
    %33 = arith.addf %29, %32 : vector<8x8xf32>
    %c0_17 = arith.constant 0 : index
    %c0_18 = arith.constant 0 : index
    %c0_19 = arith.constant 0 : index
    %34 = vector.load %arg6[%c0_17, %c0_18, %c0_19] : memref<4x32x8xbf16, #tpu.memory_space<vmem>>, vector<1x32x8xbf16>
    %35 = vector.shape_cast %34 : vector<1x32x8xbf16> to vector<32x8xbf16>
    %cst_20 = arith.constant dense<0.000000e+00> : vector<8x8xf32>
    %36 = tpu.matmul %26, %35, %cst_20 {dimension_numbers = #tpu.dot_dimension_numbers<[1], [0], [0], [1], [0, 0, 1, 1], [], []>} : vector<8x32xbf16>, vector<32x8xbf16>, vector<8x8xf32> -> vector<8x8xf32>
    %c0_21 = arith.constant 0 : index
    %c0_22 = arith.constant 0 : index
    %c0_23 = arith.constant 0 : index
    %37 = vector.load %arg9[%c0_21, %c0_22, %c0_23] : memref<4x1x8xf32, #tpu.memory_space<vmem>>, vector<1x1x8xf32>
    %38 = vector.shape_cast %37 : vector<1x1x8xf32> to vector<1x8xf32>
    %39 = vector.broadcast %38 : vector<1x8xf32> to vector<8x8xf32>
    %40 = arith.addf %36, %39 : vector<8x8xf32>
    %c0_24 = arith.constant 0 : index
    %c0_25 = arith.constant 0 : index
    %c0_26 = arith.constant 0 : index
    %41 = vector.load %arg7[%c0_24, %c0_25, %c0_26] : memref<4x32x8xbf16, #tpu.memory_space<vmem>>, vector<1x32x8xbf16>
    %42 = vector.shape_cast %41 : vector<1x32x8xbf16> to vector<32x8xbf16>
    %cst_27 = arith.constant dense<0.000000e+00> : vector<8x8xf32>
    %43 = tpu.matmul %26, %42, %cst_27 {dimension_numbers = #tpu.dot_dimension_numbers<[1], [0], [0], [1], [0, 0, 1, 1], [], []>} : vector<8x32xbf16>, vector<32x8xbf16>, vector<8x8xf32> -> vector<8x8xf32>
    %c0_28 = arith.constant 0 : index
    %c0_29 = arith.constant 0 : index
    %c0_30 = arith.constant 0 : index
    %44 = vector.load %arg10[%c0_28, %c0_29, %c0_30] : memref<4x1x8xf32, #tpu.memory_space<vmem>>, vector<1x1x8xf32>
    %45 = vector.shape_cast %44 : vector<1x1x8xf32> to vector<1x8xf32>
    %46 = vector.broadcast %45 : vector<1x8xf32> to vector<8x8xf32>
    %47 = arith.addf %43, %46 : vector<8x8xf32>
    %cst_31 = arith.constant 0.353553385 : f32
    %48 = vector.broadcast %cst_31 : f32 to vector<8x8xf32>
    %49 = arith.mulf %33, %48 : vector<8x8xf32>
    %50 = arith.truncf %49 : vector<8x8xf32> to vector<8x8xbf16>
    %c0_32 = arith.constant 0 : index
    %c0_33 = arith.constant 0 : index
    %c0_34 = arith.constant 0 : index
    %c0_35 = arith.constant 0 : index
    %51 = vector.load %arg11[%c0_32, %c0_33, %c0_34, %c0_35] : memref<1x4x8x8xbf16, #tpu.memory_space<vmem>>, vector<1x1x8x8xbf16>
    %52 = vector.shape_cast %51 : vector<1x1x8x8xbf16> to vector<8x8xbf16>
    %53 = vector.shape_cast %50 : vector<8x8xbf16> to vector<1x1x8x8xbf16>
    tpu.vector_store %arg11[%c0_32, %c0_33, %c0_34, %c0_35], %53 {strides = array<i32>} : memref<1x4x8x8xbf16, #tpu.memory_space<vmem>>, vector<1x1x8x8xbf16>,
    %54 = arith.truncf %40 : vector<8x8xf32> to vector<8x8xbf16>
    %c0_36 = arith.constant 0 : index
    %c0_37 = arith.constant 0 : index
    %c0_38 = arith.constant 0 : index
    %c0_39 = arith.constant 0 : index
    %55 = vector.load %arg12[%c0_36, %c0_37, %c0_38, %c0_39] : memref<1x4x8x8xbf16, #tpu.memory_space<vmem>>, vector<1x1x8x8xbf16>
    %56 = vector.shape_cast %55 : vector<1x1x8x8xbf16> to vector<8x8xbf16>
    %57 = vector.shape_cast %54 : vector<8x8xbf16> to vector<1x1x8x8xbf16>
    tpu.vector_store %arg12[%c0_36, %c0_37, %c0_38, %c0_39], %57 {strides = array<i32>} : memref<1x4x8x8xbf16, #tpu.memory_space<vmem>>, vector<1x1x8x8xbf16>,
    %58 = arith.truncf %47 : vector<8x8xf32> to vector<8x8xbf16>
    %c0_40 = arith.constant 0 : index
    %c0_41 = arith.constant 0 : index
    %c0_42 = arith.constant 0 : index
    %c0_43 = arith.constant 0 : index
    %59 = vector.load %arg13[%c0_40, %c0_41, %c0_42, %c0_43] : memref<1x4x8x8xbf16, #tpu.memory_space<vmem>>, vector<1x1x8x8xbf16>
    %60 = vector.shape_cast %59 : vector<1x1x8x8xbf16> to vector<8x8xbf16>
    %61 = vector.shape_cast %58 : vector<8x8xbf16> to vector<1x1x8x8xbf16>
    tpu.vector_store %arg13[%c0_40, %c0_41, %c0_42, %c0_43], %61 {strides = array<i32>} : memref<1x4x8x8xbf16, #tpu.memory_space<vmem>>, vector<1x1x8x8xbf16>,
    %c1 = arith.constant 1 : index
    %c0_44 = arith.constant 0 : index
    %c0_45 = arith.constant 0 : index
    %62 = vector.load %arg5[%c1, %c0_44, %c0_45] : memref<4x32x8xbf16, #tpu.memory_space<vmem>>, vector<1x32x8xbf16>
    %63 = vector.shape_cast %62 : vector<1x32x8xbf16> to vector<32x8xbf16>
    %cst_46 = arith.constant dense<0.000000e+00> : vector<8x8xf32>
    %64 = tpu.matmul %26, %63, %cst_46 {dimension_numbers = #tpu.dot_dimension_numbers<[1], [0], [0], [1], [0, 0, 1, 1], [], []>} : vector<8x32xbf16>, vector<32x8xbf16>, vector<8x8xf32> -> vector<8x8xf32>
    %c1_47 = arith.constant 1 : index
    %c0_48 = arith.constant 0 : index
    %c0_49 = arith.constant 0 : index
    %65 = vector.load %arg8[%c1_47, %c0_48, %c0_49] : memref<4x1x8xf32, #tpu.memory_space<vmem>>, vector<1x1x8xf32>
    %66 = vector.shape_cast %65 : vector<1x1x8xf32> to vector<1x8xf32>
    %67 = vector.broadcast %66 : vector<1x8xf32> to vector<8x8xf32>
    %68 = arith.addf %64, %67 : vector<8x8xf32>
    %c1_50 = arith.constant 1 : index
    %c0_51 = arith.constant 0 : index
    %c0_52 = arith.constant 0 : index
    %69 = vector.load %arg6[%c1_50, %c0_51, %c0_52] : memref<4x32x8xbf16, #tpu.memory_space<vmem>>, vector<1x32x8xbf16>
    %70 = vector.shape_cast %69 : vector<1x32x8xbf16> to vector<32x8xbf16>
    %cst_53 = arith.constant dense<0.000000e+00> : vector<8x8xf32>
    %71 = tpu.matmul %26, %70, %cst_53 {dimension_numbers = #tpu.dot_dimension_numbers<[1], [0], [0], [1], [0, 0, 1, 1], [], []>} : vector<8x32xbf16>, vector<32x8xbf16>, vector<8x8xf32> -> vector<8x8xf32>
    %c1_54 = arith.constant 1 : index
    %c0_55 = arith.constant 0 : index
    %c0_56 = arith.constant 0 : index
    %72 = vector.load %arg9[%c1_54, %c0_55, %c0_56] : memref<4x1x8xf32, #tpu.memory_space<vmem>>, vector<1x1x8xf32>
    %73 = vector.shape_cast %72 : vector<1x1x8xf32> to vector<1x8xf32>
    %74 = vector.broadcast %73 : vector<1x8xf32> to vector<8x8xf32>
    %75 = arith.addf %71, %74 : vector<8x8xf32>
    %c1_57 = arith.constant 1 : index
    %c0_58 = arith.constant 0 : index
    %c0_59 = arith.constant 0 : index
    %76 = vector.load %arg7[%c1_57, %c0_58, %c0_59] : memref<4x32x8xbf16, #tpu.memory_space<vmem>>, vector<1x32x8xbf16>
    %77 = vector.shape_cast %76 : vector<1x32x8xbf16> to vector<32x8xbf16>
    %cst_60 = arith.constant dense<0.000000e+00> : vector<8x8xf32>
    %78 = tpu.matmul %26, %77, %cst_60 {dimension_numbers = #tpu.dot_dimension_numbers<[1], [0], [0], [1], [0, 0, 1, 1], [], []>} : vector<8x32xbf16>, vector<32x8xbf16>, vector<8x8xf32> -> vector<8x8xf32>
    %c1_61 = arith.constant 1 : index
    %c0_62 = arith.constant 0 : index
    %c0_63 = arith.constant 0 : index
    %79 = vector.load %arg10[%c1_61, %c0_62, %c0_63] : memref<4x1x8xf32, #tpu.memory_space<vmem>>, vector<1x1x8xf32>
    %80 = vector.shape_cast %79 : vector<1x1x8xf32> to vector<1x8xf32>
    %81 = vector.broadcast %80 : vector<1x8xf32> to vector<8x8xf32>
    %82 = arith.addf %78, %81 : vector<8x8xf32>
    %cst_64 = arith.constant 0.353553385 : f32
    %83 = vector.broadcast %cst_64 : f32 to vector<8x8xf32>
    %84 = arith.mulf %68, %83 : vector<8x8xf32>
    %85 = arith.truncf %84 : vector<8x8xf32> to vector<8x8xbf16>
    %c0_65 = arith.constant 0 : index
    %c1_66 = arith.constant 1 : index
    %c0_67 = arith.constant 0 : index
    %c0_68 = arith.constant 0 : index
    %86 = vector.load %arg11[%c0_65, %c1_66, %c0_67, %c0_68] : memref<1x4x8x8xbf16, #tpu.memory_space<vmem>>, vector<1x1x8x8xbf16>
    %87 = vector.shape_cast %86 : vector<1x1x8x8xbf16> to vector<8x8xbf16>
    %88 = vector.shape_cast %85 : vector<8x8xbf16> to vector<1x1x8x8xbf16>
    tpu.vector_store %arg11[%c0_65, %c1_66, %c0_67, %c0_68], %88 {strides = array<i32>} : memref<1x4x8x8xbf16, #tpu.memory_space<vmem>>, vector<1x1x8x8xbf16>,
    %89 = arith.truncf %75 : vector<8x8xf32> to vector<8x8xbf16>
    %c0_69 = arith.constant 0 : index
    %c1_70 = arith.constant 1 : index
    %c0_71 = arith.constant 0 : index
    %c0_72 = arith.constant 0 : index
    %90 = vector.load %arg12[%c0_69, %c1_70, %c0_71, %c0_72] : memref<1x4x8x8xbf16, #tpu.memory_space<vmem>>, vector<1x1x8x8xbf16>
    %91 = vector.shape_cast %90 : vector<1x1x8x8xbf16> to vector<8x8xbf16>
    %92 = vector.shape_cast %89 : vector<8x8xbf16> to vector<1x1x8x8xbf16>
    tpu.vector_store %arg12[%c0_69, %c1_70, %c0_71, %c0_72], %92 {strides = array<i32>} : memref<1x4x8x8xbf16, #tpu.memory_space<vmem>>, vector<1x1x8x8xbf16>,
    %93 = arith.truncf %82 : vector<8x8xf32> to vector<8x8xbf16>
    %c0_73 = arith.constant 0 : index
    %c1_74 = arith.constant 1 : index
    %c0_75 = arith.constant 0 : index
    %c0_76 = arith.constant 0 : index
    %94 = vector.load %arg13[%c0_73, %c1_74, %c0_75, %c0_76] : memref<1x4x8x8xbf16, #tpu.memory_space<vmem>>, vector<1x1x8x8xbf16>
    %95 = vector.shape_cast %94 : vector<1x1x8x8xbf16> to vector<8x8xbf16>
    %96 = vector.shape_cast %93 : vector<8x8xbf16> to vector<1x1x8x8xbf16>
    tpu.vector_store %arg13[%c0_73, %c1_74, %c0_75, %c0_76], %96 {strides = array<i32>} : memref<1x4x8x8xbf16, #tpu.memory_space<vmem>>, vector<1x1x8x8xbf16>,
    %c2 = arith.constant 2 : index
    %c0_77 = arith.constant 0 : index
    %c0_78 = arith.constant 0 : index
    %97 = vector.load %arg5[%c2, %c0_77, %c0_78] : memref<4x32x8xbf16, #tpu.memory_space<vmem>>, vector<1x32x8xbf16>
    %98 = vector.shape_cast %97 : vector<1x32x8xbf16> to vector<32x8xbf16>
    %cst_79 = arith.constant dense<0.000000e+00> : vector<8x8xf32>
    %99 = tpu.matmul %26, %98, %cst_79 {dimension_numbers = #tpu.dot_dimension_numbers<[1], [0], [0], [1], [0, 0, 1, 1], [], []>} : vector<8x32xbf16>, vector<32x8xbf16>, vector<8x8xf32> -> vector<8x8xf32>
    %c2_80 = arith.constant 2 : index
    %c0_81 = arith.constant 0 : index
    %c0_82 = arith.constant 0 : index
    %100 = vector.load %arg8[%c2_80, %c0_81, %c0_82] : memref<4x1x8xf32, #tpu.memory_space<vmem>>, vector<1x1x8xf32>
    %101 = vector.shape_cast %100 : vector<1x1x8xf32> to vector<1x8xf32>
    %102 = vector.broadcast %101 : vector<1x8xf32> to vector<8x8xf32>
    %103 = arith.addf %99, %102 : vector<8x8xf32>
    %c2_83 = arith.constant 2 : index
    %c0_84 = arith.constant 0 : index
    %c0_85 = arith.constant 0 : index
    %104 = vector.load %arg6[%c2_83, %c0_84, %c0_85] : memref<4x32x8xbf16, #tpu.memory_space<vmem>>, vector<1x32x8xbf16>
    %105 = vector.shape_cast %104 : vector<1x32x8xbf16> to vector<32x8xbf16>
    %cst_86 = arith.constant dense<0.000000e+00> : vector<8x8xf32>
    %106 = tpu.matmul %26, %105, %cst_86 {dimension_numbers = #tpu.dot_dimension_numbers<[1], [0], [0], [1], [0, 0, 1, 1], [], []>} : vector<8x32xbf16>, vector<32x8xbf16>, vector<8x8xf32> -> vector<8x8xf32>
    %c2_87 = arith.constant 2 : index
    %c0_88 = arith.constant 0 : index
    %c0_89 = arith.constant 0 : index
    %107 = vector.load %arg9[%c2_87, %c0_88, %c0_89] : memref<4x1x8xf32, #tpu.memory_space<vmem>>, vector<1x1x8xf32>
    %108 = vector.shape_cast %107 : vector<1x1x8xf32> to vector<1x8xf32>
    %109 = vector.broadcast %108 : vector<1x8xf32> to vector<8x8xf32>
    %110 = arith.addf %106, %109 : vector<8x8xf32>
    %c2_90 = arith.constant 2 : index
    %c0_91 = arith.constant 0 : index
    %c0_92 = arith.constant 0 : index
    %111 = vector.load %arg7[%c2_90, %c0_91, %c0_92] : memref<4x32x8xbf16, #tpu.memory_space<vmem>>, vector<1x32x8xbf16>
    %112 = vector.shape_cast %111 : vector<1x32x8xbf16> to vector<32x8xbf16>
    %cst_93 = arith.constant dense<0.000000e+00> : vector<8x8xf32>
    %113 = tpu.matmul %26, %112, %cst_93 {dimension_numbers = #tpu.dot_dimension_numbers<[1], [0], [0], [1], [0, 0, 1, 1], [], []>} : vector<8x32xbf16>, vector<32x8xbf16>, vector<8x8xf32> -> vector<8x8xf32>
    %c2_94 = arith.constant 2 : index
    %c0_95 = arith.constant 0 : index
    %c0_96 = arith.constant 0 : index
    %114 = vector.load %arg10[%c2_94, %c0_95, %c0_96] : memref<4x1x8xf32, #tpu.memory_space<vmem>>, vector<1x1x8xf32>
    %115 = vector.shape_cast %114 : vector<1x1x8xf32> to vector<1x8xf32>
    %116 = vector.broadcast %115 : vector<1x8xf32> to vector<8x8xf32>
    %117 = arith.addf %113, %116 : vector<8x8xf32>
    %cst_97 = arith.constant 0.353553385 : f32
    %118 = vector.broadcast %cst_97 : f32 to vector<8x8xf32>
    %119 = arith.mulf %103, %118 : vector<8x8xf32>
    %120 = arith.truncf %119 : vector<8x8xf32> to vector<8x8xbf16>
    %c0_98 = arith.constant 0 : index
    %c2_99 = arith.constant 2 : index
    %c0_100 = arith.constant 0 : index
    %c0_101 = arith.constant 0 : index
    %121 = vector.load %arg11[%c0_98, %c2_99, %c0_100, %c0_101] : memref<1x4x8x8xbf16, #tpu.memory_space<vmem>>, vector<1x1x8x8xbf16>
    %122 = vector.shape_cast %121 : vector<1x1x8x8xbf16> to vector<8x8xbf16>
    %123 = vector.shape_cast %120 : vector<8x8xbf16> to vector<1x1x8x8xbf16>
    tpu.vector_store %arg11[%c0_98, %c2_99, %c0_100, %c0_101], %123 {strides = array<i32>} : memref<1x4x8x8xbf16, #tpu.memory_space<vmem>>, vector<1x1x8x8xbf16>,
    %124 = arith.truncf %110 : vector<8x8xf32> to vector<8x8xbf16>
    %c0_102 = arith.constant 0 : index
    %c2_103 = arith.constant 2 : index
    %c0_104 = arith.constant 0 : index
    %c0_105 = arith.constant 0 : index
    %125 = vector.load %arg12[%c0_102, %c2_103, %c0_104, %c0_105] : memref<1x4x8x8xbf16, #tpu.memory_space<vmem>>, vector<1x1x8x8xbf16>
    %126 = vector.shape_cast %125 : vector<1x1x8x8xbf16> to vector<8x8xbf16>
    %127 = vector.shape_cast %124 : vector<8x8xbf16> to vector<1x1x8x8xbf16>
    tpu.vector_store %arg12[%c0_102, %c2_103, %c0_104, %c0_105], %127 {strides = array<i32>} : memref<1x4x8x8xbf16, #tpu.memory_space<vmem>>, vector<1x1x8x8xbf16>,
    %128 = arith.truncf %117 : vector<8x8xf32> to vector<8x8xbf16>
    %c0_106 = arith.constant 0 : index
    %c2_107 = arith.constant 2 : index
    %c0_108 = arith.constant 0 : index
    %c0_109 = arith.constant 0 : index
    %129 = vector.load %arg13[%c0_106, %c2_107, %c0_108, %c0_109] : memref<1x4x8x8xbf16, #tpu.memory_space<vmem>>, vector<1x1x8x8xbf16>
    %130 = vector.shape_cast %129 : vector<1x1x8x8xbf16> to vector<8x8xbf16>
    %131 = vector.shape_cast %128 : vector<8x8xbf16> to vector<1x1x8x8xbf16>
    tpu.vector_store %arg13[%c0_106, %c2_107, %c0_108, %c0_109], %131 {strides = array<i32>} : memref<1x4x8x8xbf16, #tpu.memory_space<vmem>>, vector<1x1x8x8xbf16>,
    %c3 = arith.constant 3 : index
    %c0_110 = arith.constant 0 : index
    %c0_111 = arith.constant 0 : index
    %132 = vector.load %arg5[%c3, %c0_110, %c0_111] : memref<4x32x8xbf16, #tpu.memory_space<vmem>>, vector<1x32x8xbf16>
    %133 = vector.shape_cast %132 : vector<1x32x8xbf16> to vector<32x8xbf16>
    %cst_112 = arith.constant dense<0.000000e+00> : vector<8x8xf32>
    %134 = tpu.matmul %26, %133, %cst_112 {dimension_numbers = #tpu.dot_dimension_numbers<[1], [0], [0], [1], [0, 0, 1, 1], [], []>} : vector<8x32xbf16>, vector<32x8xbf16>, vector<8x8xf32> -> vector<8x8xf32>
    %c3_113 = arith.constant 3 : index
    %c0_114 = arith.constant 0 : index
    %c0_115 = arith.constant 0 : index
    %135 = vector.load %arg8[%c3_113, %c0_114, %c0_115] : memref<4x1x8xf32, #tpu.memory_space<vmem>>, vector<1x1x8xf32>
    %136 = vector.shape_cast %135 : vector<1x1x8xf32> to vector<1x8xf32>
    %137 = vector.broadcast %136 : vector<1x8xf32> to vector<8x8xf32>
    %138 = arith.addf %134, %137 : vector<8x8xf32>
    %c3_116 = arith.constant 3 : index
    %c0_117 = arith.constant 0 : index
    %c0_118 = arith.constant 0 : index
    %139 = vector.load %arg6[%c3_116, %c0_117, %c0_118] : memref<4x32x8xbf16, #tpu.memory_space<vmem>>, vector<1x32x8xbf16>
    %140 = vector.shape_cast %139 : vector<1x32x8xbf16> to vector<32x8xbf16>
    %cst_119 = arith.constant dense<0.000000e+00> : vector<8x8xf32>
    %141 = tpu.matmul %26, %140, %cst_119 {dimension_numbers = #tpu.dot_dimension_numbers<[1], [0], [0], [1], [0, 0, 1, 1], [], []>} : vector<8x32xbf16>, vector<32x8xbf16>, vector<8x8xf32> -> vector<8x8xf32>
    %c3_120 = arith.constant 3 : index
    %c0_121 = arith.constant 0 : index
    %c0_122 = arith.constant 0 : index
    %142 = vector.load %arg9[%c3_120, %c0_121, %c0_122] : memref<4x1x8xf32, #tpu.memory_space<vmem>>, vector<1x1x8xf32>
    %143 = vector.shape_cast %142 : vector<1x1x8xf32> to vector<1x8xf32>
    %144 = vector.broadcast %143 : vector<1x8xf32> to vector<8x8xf32>
    %145 = arith.addf %141, %144 : vector<8x8xf32>
    %c3_123 = arith.constant 3 : index
    %c0_124 = arith.constant 0 : index
    %c0_125 = arith.constant 0 : index
    %146 = vector.load %arg7[%c3_123, %c0_124, %c0_125] : memref<4x32x8xbf16, #tpu.memory_space<vmem>>, vector<1x32x8xbf16>
    %147 = vector.shape_cast %146 : vector<1x32x8xbf16> to vector<32x8xbf16>
    %cst_126 = arith.constant dense<0.000000e+00> : vector<8x8xf32>
    %148 = tpu.matmul %26, %147, %cst_126 {dimension_numbers = #tpu.dot_dimension_numbers<[1], [0], [0], [1], [0, 0, 1, 1], [], []>} : vector<8x32xbf16>, vector<32x8xbf16>, vector<8x8xf32> -> vector<8x8xf32>
    %c3_127 = arith.constant 3 : index
    %c0_128 = arith.constant 0 : index
    %c0_129 = arith.constant 0 : index
    %149 = vector.load %arg10[%c3_127, %c0_128, %c0_129] : memref<4x1x8xf32, #tpu.memory_space<vmem>>, vector<1x1x8xf32>
    %150 = vector.shape_cast %149 : vector<1x1x8xf32> to vector<1x8xf32>
    %151 = vector.broadcast %150 : vector<1x8xf32> to vector<8x8xf32>
    %152 = arith.addf %148, %151 : vector<8x8xf32>
    %cst_130 = arith.constant 0.353553385 : f32
    %153 = vector.broadcast %cst_130 : f32 to vector<8x8xf32>
    %154 = arith.mulf %138, %153 : vector<8x8xf32>
    %155 = arith.truncf %154 : vector<8x8xf32> to vector<8x8xbf16>
    %c0_131 = arith.constant 0 : index
    %c3_132 = arith.constant 3 : index
    %c0_133 = arith.constant 0 : index
    %c0_134 = arith.constant 0 : index
    %156 = vector.load %arg11[%c0_131, %c3_132, %c0_133, %c0_134] : memref<1x4x8x8xbf16, #tpu.memory_space<vmem>>, vector<1x1x8x8xbf16>
    %157 = vector.shape_cast %156 : vector<1x1x8x8xbf16> to vector<8x8xbf16>
    %158 = vector.shape_cast %155 : vector<8x8xbf16> to vector<1x1x8x8xbf16>
    tpu.vector_store %arg11[%c0_131, %c3_132, %c0_133, %c0_134], %158 {strides = array<i32>} : memref<1x4x8x8xbf16, #tpu.memory_space<vmem>>, vector<1x1x8x8xbf16>,
    %159 = arith.truncf %145 : vector<8x8xf32> to vector<8x8xbf16>
    %c0_135 = arith.constant 0 : index
    %c3_136 = arith.constant 3 : index
    %c0_137 = arith.constant 0 : index
    %c0_138 = arith.constant 0 : index
    %160 = vector.load %arg12[%c0_135, %c3_136, %c0_137, %c0_138] : memref<1x4x8x8xbf16, #tpu.memory_space<vmem>>, vector<1x1x8x8xbf16>
    %161 = vector.shape_cast %160 : vector<1x1x8x8xbf16> to vector<8x8xbf16>
    %162 = vector.shape_cast %159 : vector<8x8xbf16> to vector<1x1x8x8xbf16>
    tpu.vector_store %arg12[%c0_135, %c3_136, %c0_137, %c0_138], %162 {strides = array<i32>} : memref<1x4x8x8xbf16, #tpu.memory_space<vmem>>, vector<1x1x8x8xbf16>,
    %163 = arith.truncf %152 : vector<8x8xf32> to vector<8x8xbf16>
    %c0_139 = arith.constant 0 : index
    %c3_140 = arith.constant 3 : index
    %c0_141 = arith.constant 0 : index
    %c0_142 = arith.constant 0 : index
    %164 = vector.load %arg13[%c0_139, %c3_140, %c0_141, %c0_142] : memref<1x4x8x8xbf16, #tpu.memory_space<vmem>>, vector<1x1x8x8xbf16>
    %165 = vector.shape_cast %164 : vector<1x1x8x8xbf16> to vector<8x8xbf16>
    %166 = vector.shape_cast %163 : vector<8x8xbf16> to vector<1x1x8x8xbf16>
    tpu.vector_store %arg13[%c0_139, %c3_140, %c0_141, %c0_142], %166 {strides = array<i32>} : memref<1x4x8x8xbf16, #tpu.memory_space<vmem>>, vector<1x1x8x8xbf16>,
    return
  }
  func.func @transform_0(%arg0: i32, %arg1: i32) -> (i32, i32, i32) {
    %c0_i32 = arith.constant 0 : i32
    %c0_i32_0 = arith.constant 0 : i32
    return %arg0, %arg1, %c0_i32 : i32, i32, i32
  }
  func.func @transform_1(%arg0: i32, %arg1: i32) -> (i32, i32) {
    %c0_i32 = arith.constant 0 : i32
    %c0_i32_0 = arith.constant 0 : i32
    %c0_i32_1 = arith.constant 0 : i32
    return %c0_i32, %c0_i32_0 : i32, i32
  }
  func.func @transform_2(%arg0: i32, %arg1: i32) -> (i32, i32) {
    %c0_i32 = arith.constant 0 : i32
    %c0_i32_0 = arith.constant 0 : i32
    %c0_i32_1 = arith.constant 0 : i32
    return %c0_i32, %c0_i32_0 : i32, i32
  }
  func.func @transform_3(%arg0: i32, %arg1: i32) -> (i32, i32, i32) {
    %c0_i32 = arith.constant 0 : i32
    %c0_i32_0 = arith.constant 0 : i32
    %c0_i32_1 = arith.constant 0 : i32
    %c0_i32_2 = arith.constant 0 : i32
    return %c0_i32, %c0_i32_0, %c0_i32_1 : i32, i32, i32
  }
  func.func @transform_4(%arg0: i32, %arg1: i32) -> (i32, i32, i32) {
    %c0_i32 = arith.constant 0 : i32
    %c0_i32_0 = arith.constant 0 : i32
    %c0_i32_1 = arith.constant 0 : i32
    %c0_i32_2 = arith.constant 0 : i32
    return %c0_i32, %c0_i32_0, %c0_i32_1 : i32, i32, i32
  }
  func.func @transform_5(%arg0: i32, %arg1: i32) -> (i32, i32, i32) {
    %c0_i32 = arith.constant 0 : i32
    %c0_i32_0 = arith.constant 0 : i32
    %c0_i32_1 = arith.constant 0 : i32
    %c0_i32_2 = arith.constant 0 : i32
    return %c0_i32, %c0_i32_0, %c0_i32_1 : i32, i32, i32
  }
  func.func @transform_6(%arg0: i32, %arg1: i32) -> (i32, i32, i32) {
    %c0_i32 = arith.constant 0 : i32
    %c0_i32_0 = arith.constant 0 : i32
    %c0_i32_1 = arith.constant 0 : i32
    %c0_i32_2 = arith.constant 0 : i32
    return %c0_i32, %c0_i32_0, %c0_i32_1 : i32, i32, i32
  }
  func.func @transform_7(%arg0: i32, %arg1: i32) -> (i32, i32, i32) {
    %c0_i32 = arith.constant 0 : i32
    %c0_i32_0 = arith.constant 0 : i32
    %c0_i32_1 = arith.constant 0 : i32
    %c0_i32_2 = arith.constant 0 : i32
    return %c0_i32, %c0_i32_0, %c0_i32_1 : i32, i32, i32
  }
  func.func @transform_8(%arg0: i32, %arg1: i32) -> (i32, i32, i32) {
    %c0_i32 = arith.constant 0 : i32
    %c0_i32_0 = arith.constant 0 : i32
    %c0_i32_1 = arith.constant 0 : i32
    %c0_i32_2 = arith.constant 0 : i32
    return %c0_i32, %c0_i32_0, %c0_i32_1 : i32, i32, i32
  }
  func.func @transform_9(%arg0: i32, %arg1: i32) -> (i32, i32, i32, i32) {
    %c0_i32 = arith.constant 0 : i32
    %c0_i32_0 = arith.constant 0 : i32
    %c0_i32_1 = arith.constant 0 : i32
    return %arg0, %c0_i32, %arg1, %c0_i32_0 : i32, i32, i32, i32
  }
  func.func @transform_10(%arg0: i32, %arg1: i32) -> (i32, i32, i32, i32) {
    %c0_i32 = arith.constant 0 : i32
    %c0_i32_0 = arith.constant 0 : i32
    %c0_i32_1 = arith.constant 0 : i32
    return %arg0, %c0_i32, %arg1, %c0_i32_0 : i32, i32, i32, i32
  }
  func.func @transform_11(%arg0: i32, %arg1: i32) -> (i32, i32, i32, i32) {
    %c0_i32 = arith.constant 0 : i32
    %c0_i32_0 = arith.constant 0 : i32
    %c0_i32_1 = arith.constant 0 : i32
    return %arg0, %c0_i32, %arg1, %c0_i32_0 : i32, i32, i32, i32
  }
}

</mosaic_0001>

<bundles_post_ra>
// kernel: tpu_custom_call.1
= control target key start
LH: loop header
LB: loop body
LE: loop exit
PB: predicated region body
PF: predicated region fallthrough
CT: control target
= control target key end

     0   :  { %s1977_s0 = inlined_call_operand.vmem [shape: f32[2,8,32], index: 0, kind: input, shape index: {}]   ;;  %s1978_s1 = inlined_call_operand.vmem [shape: f32[1,32], index: 1, kind: input, shape index: {}]   ;;  %s1979_s2 = inlined_call_operand.vmem [shape: f32[1,32], index: 2, kind: input, shape index: {}]   ;;  %s1980_s3 = inlined_call_operand.vmem [shape: bf16[4,32,8], index: 3, kind: input, shape index: {}]   ;;  %s1981_s4 = inlined_call_operand.vmem [shape: bf16[4,32,8], index: 4, kind: input, shape index: {}]   ;;  %s1982_s5 = inlined_call_operand.vmem [shape: bf16[4,32,8], index: 5, kind: input, shape index: {}]   ;;  %s1983_s6 = inlined_call_operand.vmem [shape: f32[4,1,8], index: 6, kind: input, shape index: {}]   ;;  %s1984_s7 = inlined_call_operand.vmem [shape: f32[4,1,8], index: 7, kind: input, shape index: {}]   ;;  %s1985_s8 = inlined_call_operand.vmem [shape: f32[4,1,8], index: 8, kind: input, shape index: {}]   ;;  %s1986_s9 = inlined_call_operand.hbm [shape: bf16[2,4,8,8], index: 9, kind: output, shape index: {0}]   ;;  %s1987_s10 = inlined_call_operand.hbm [shape: bf16[2,4,8,8], index: 10, kind: output, shape index: {1}]   ;;  %s1988_s11 = inlined_call_operand.hbm [shape: bf16[2,4,8,8], index: 11, kind: output, shape index: {2}]  }
   0x1   :  { %1994 = sst [smem:[#allocation9_spill]] %s1977_s0 }
   0x2   :  { %1995 = sst [smem:[#allocation10_spill]] %s1978_s1 }
   0x3   :  { %1996 = sst [smem:[#allocation11_spill]] %s1979_s2 }
   0x4   :  { %1997 = sst [smem:[#allocation12_spill]] %s1980_s3 }
   0x5   :  { %1998 = sst [smem:[#allocation13_spill]] %s1981_s4 }
   0x6   :  { %1999 = sst [smem:[#allocation14_spill]] %s1982_s5 }
   0x7   :  { %17 = vsyncpa [#allocation3], 0 }
   0x8   :  { %19 = vsyncpa [#allocation3 + $0x1], 0 }
   0x9   :  { %20 = vsyncpa [#allocation5], 0 }
   0xa   :  { %22 = vsyncpa [#allocation5 + $0x1], 0  ;;  %s1630_s17 = smov 0   ;;  %s1632_s18 = smov 0  }
   0xb   :  { %s1634_s19 = smov 0   ;;  %s1636_s20 = smov 0  }
   0xc   :  { %s1638_s21 = smov 0   ;;  %s1640_s22 = smov 0  }
   0xd LB: > { %s1990_s23 = sadd.s32 4294967295, %s1565_s22   ;;  %s1989_s24 = sadd.s32 4294967294, %s1565_s22   ;;  %s1565_s22 = sphi %s1640_s22, %s28_s22   ;;  %s1561_s21 = sphi %s1638_s21, %s2018_s21   ;;  %s1557_s20 = sphi %s1636_s20, %s2017_s20   ;;  %s1553_s19 = sphi %s1634_s19, %s2016_s19   ;;  %s1549_s18 = sphi %s1632_s18, %s2015_s18   ;;  %s1545_s17 = sphi %s1630_s17, %s2014_s17  }
   0xe   : > { %s40_s25 = sadd.s32 1, %s1561_s21  ;;  %s245_s26 = sadd.s32 1, %s1553_s19 }
   0xf   : > { %p42_p0 = scmp.ge.s32.totalorder %s40_s25, 2  ;;  %p255_p1 = scmp.ne.s32.totalorder %s1553_s19, %s1549_s18 }
  0x10   : > { %p256_p2 = scmp.eq.s32.totalorder %s1990_s23, 1  ;;  %p261_p3 = scmp.ne.s32.totalorder %s1549_s18, %s1545_s17 }
  0x11   : > { %s2020_s25 = smov (%p42_p0, %s40_s25), 0  ;;  %p262_p5 = scmp.eq.s32.totalorder %s1989_s24, 1 }
  0x12   : > { %p1672_p4 = por %p256_p2, %p255_p1  ;;  %s240_s28 = ssub.s32 %s1561_s21, %s2020_s25 }
  0x13   : > { %p1136_p6 = scmp.ge.s32.totalorder %s1565_s22, 1  ;;  %p243_p7 = scmp.eq.s32.totalorder %s240_s28, 0 }
  0x14   : > { %p1681_p8 = por %p262_p5, %p261_p3  ;;  %p370_p9 = scmp.lt.s32.totalorder %s1565_s22, 3 }
  0x15   : > { %s1687_s30 = scalar_select %p243_p7, %s1553_s19, %s245_s26  }
  0x16   : > { %p371_p10 = pnand %p1136_p6, %p370_p9 }
  0x17   : > { %p422_p11 = scmp.lt.s32.totalorder (!%p371_p10), %s1557_s20, 1  ;;  %s2002_s0 = sld [smem:[#allocation9_spill]] (!%p371_p10) }
  0x18   : > { %374 = sbr.rel (%p371_p10) target bundleno = 499 (0x1f3), region = 56  ;;  %s2003_s3 = sld [smem:[#allocation12_spill]] (!%p371_p10) }
  0x19   : > { %s2004_s4 = sld [smem:[#allocation13_spill]] (!%p371_p10)  ;;  %s2008_s28 = sadd.s32 (!%p371_p10), 4294967295, %s1565_s22  }
  0x1a   : > { %s2005_s5 = sld [smem:[#allocation14_spill]] (!%p371_p10)  ;;  %s2009_s24 = sand.u32 (!%p371_p10), 1, %s1549_s18  }
  0x1b   : > { %s2006_s1 = sld [smem:[#allocation10_spill]] (!%p371_p10)  ;;  %s928_s23 = scalar_lea.sflag (!%p371_p10), [#allocation3], %s2009_s24 }
  0x1c   : > { %s2007_s2 = sld [smem:[#allocation11_spill]] (!%p371_p10) }
  0x1d   : > { %s423_s12 = scalar_select %p422_p11, %s1557_s20, 1  ;;  %vm433_vm0 = vcmask 261120   ;;  %v1567_v2 = vmov 32.0   ;;  %v1411_v54 = vld [vmem:[%s1983_s6] ss:$0 sm:$0xff]  ;;  %vm576_vm5 = vcmask 60416  }
  0x1e   : > { %1423 = vrcp.f32 %v1567_v2  ;;  %v1315_v14 = vld [vmem:[%s2003_s3 + $0x8] sm:$0xff]  ;;  %v1321_v17 = vld [vmem:[%s2003_s3 + $0x18] sm:$0xff]  ;;  %v1314_v18 = vld [vmem:[%s2003_s3] sm:$0xff] }
  0x1f   : > { %s1140_s13 = sshll.u32 %s423_s12, 3  ;;  %v1317_v15 = vld [vmem:[%s2004_s4 + $0x8] sm:$0xff]  ;;  %501 = vmatpush.bf16.msra.mxu0 %v1315_v14  ;;  %610 = vmatpush.bf16.msra.mxu3 %v1321_v17  ;;  %v1316_v19 = vld [vmem:[%s2004_s4] sm:$0xff]  ;;  %v1320_v21 = vld [vmem:[%s2003_s3 + $0x10] sm:$0xff]  ;;  %s1991_s12 = sand.u32 1, %s1549_s18  }
  0x20   : > { %s428_s16 = scalar_lea.vmem %s2002_s0, %s1140_s13  ;;  %v1319_v16 = vld [vmem:[%s2005_s5 + $0x8] sm:$0xff]  ;;  %534 = vmatpush.bf16.msra.mxu1 %v1317_v15  ;;  %v1318_v20 = vld [vmem:[%s2005_s5] sm:$0xff]  ;;  %v1323_v25 = vld [vmem:[%s2004_s4 + $0x18] sm:$0xff]  ;;  %s1137_s0 = sshll.u32 %s1991_s12, 4 }
  0x21   : > { %v430_v0 = vld [vmem:[%s428_s16] sm:$0xff]  ;;  %567 = vmatpush.bf16.msra.mxu2 %v1319_v16  ;;  %v1327_v23 = vld [vmem:[%s2003_s3 + $0x28] sm:$0xff]  ;;  %v1325_v27 = vld [vmem:[%s2005_s5 + $0x18] sm:$0xff]  ;;  %s1801_s13 = scalar_lea.vmem [#allocation4], %s1137_s0  ;;  %s1805_s14 = scalar_lea.vmem [#allocation2], %s1137_s0 }
  0x22   : > { %v434_v1 = vsel %vm433_vm0, %v430_v0, 0.0  ;;  %v1329_v24 = vld [vmem:[%s2004_s4 + $0x28] sm:$0xff]  ;;  %v1326_v28 = vld [vmem:[%s2003_s3 + $0x20] sm:$0xff]  ;;  %v1322_v31 = vld [vmem:[%s2004_s4 + $0x10] sm:$0xff]  ;;  %s1809_s15 = scalar_lea.vmem [#allocation6], %s1137_s0  ;;  %s1834_s16 = sshll.u32 %s1557_s20, 4 }
  0x23   : > { %435 = vadd.xlane.f32.xlu0 %v434_v1  ;;  %502 = vmatpush.bf16.msra.mxu0 %v1314_v18  ;;  %v1328_v29 = vld [vmem:[%s2004_s4 + $0x20] sm:$0xff]  ;;  %v1324_v32 = vld [vmem:[%s2005_s5 + $0x10] sm:$0xff]  ;;  %v1335_v46 = vld [vmem:[%s2004_s4 + $0x38] sm:$0xff]  ;;  %s950_s20 = scalar_lea.hbm %s1986_s9, %s1834_s16  ;;  %s1875_s12 = sand.u32 1, %s2008_s28  }
  0x24   : > { %v1424_v3 = vpop.eup %1423  ;;  %535 = vmatpush.bf16.msra.mxu1 %v1316_v19  ;;  %611 = vmatpush.bf16.msra.mxu3 %v1320_v21  ;;  %v1409_v39 = vld [vmem:[%s2006_s1] ss:$0 sm:$0xff]  ;;  %v1337_v47 = vld [vmem:[%s2005_s5 + $0x38] sm:$0xff]  ;;  %v1331_v48 = vld [vmem:[%s2005_s5 + $0x28] sm:$0xff]  ;;  %s951_s1 = sshll.u32 %s1805_s14, 4  ;;  %s1849_s26 = sshll.u32 %s950_s20, 4  ;;  %s1851_s1 = int_to_ptr.vmem [resolvable:$true] %s951_s1  ;;  %s954_s26 = int_to_ptr.hbm [resolvable:$true] %s1849_s26 }
  0x25   : > { %v438_v4 = vmul.f32 32.0, %v1424_v3  ;;  %vm442_vm1 = vweird.f32 %v1424_v3  ;;  %568 = vmatpush.bf16.msra.mxu2 %v1318_v20  ;;  %v1410_v41 = vld [vmem:[%s2007_s2] ss:$0 sm:$0xff]  ;;  %v1333_v49 = vld [vmem:[%s2003_s3 + $0x38] sm:$0xff]  ;;  %v1334_v50 = vld [vmem:[%s2004_s4 + $0x30] sm:$0xff]  ;;  %s1441_s20 = sshra.s32 %s954_s26, 4  ;;  %s1442_s20 = int_to_ptr.hbm [resolvable:$true] %s1441_s20 }
  0x26   : > { %v1336_v51 = vld [vmem:[%s2005_s5 + $0x30] sm:$0xff]  ;;  %v1330_v52 = vld [vmem:[%s2005_s5 + $0x20] sm:$0xff]  ;;  %s1443_s4 = scalar_lea.hbm %s1442_s20, 16  ;;  %s1447_s28 = scalar_lea.hbm %s1986_s9, 32 }
  0x27   : > { %v439_v5 = vsub.f32 1.0, %v438_v4  ;;  %645 = vmatpush.bf16.msrb.mxu0 %v1323_v25  ;;  %v1332_v53 = vld [vmem:[%s2003_s3 + $0x30] sm:$0xff]  ;;  %v1412_v55 = vld [vmem:[%s1984_s7] ss:$0 sm:$0xff]  ;;  %v1414_v63 = vld [vmem:[%s1983_s6 + $0x1] ss:$0 sm:$0xff]  ;;  %s968_s3 = scalar_lea.hbm %s1987_s10, %s1834_s16  ;;  %p1444_p12 = scmp.ne.s32.totalorder %s1442_s20, %s1443_s4 }
  0x28   : > { %760 = vmatpush.bf16.msrb.mxu3 %v1329_v24  ;;  %680 = vmatpush.bf16.msrb.mxu1 %v1325_v27  ;;  %v1413_v62 = vld [vmem:[%s1985_s8] ss:$0 sm:$0xff]  ;;  %v1417_v20 = vld [vmem:[%s1983_s6 + $0x2] ss:$0 sm:$0xff]  ;;  %s1877_s2 = sshll.u32 %s968_s3, 4  ;;  %p1448_p1 = scmp.lt.s32.totalorder %s1442_s20, %s1986_s9  ;;  %s972_s2 = int_to_ptr.hbm [resolvable:$true] %s1877_s2 }
  0x29   : > { %v440_v6 = vmul.f32 %v1424_v3, %v439_v5  ;;  %725 = vmatpush.bf16.msrb.mxu2 %v1327_v23  ;;  %v1418_v21 = vld [vmem:[%s1984_s7 + $0x2] ss:$0 sm:$0xff]  ;;  %p1445_p13 = pnand %p1444_p12, %p1672_p4  ;;  %p1449_p2 = scmp.lt.s32.totalorder %s1447_s28, %s1443_s4 }
  0x2b   : > { %v441_v7 = vadd.f32 %v1424_v3, %v440_v6  ;;  %646 = vmatpush.bf16.msrb.mxu0 %v1322_v31  ;;  %v1419_v31 = vld [vmem:[%s1985_s8 + $0x2] ss:$0 sm:$0xff]  ;;  %p1446_p0 = pneg %p1445_p13  ;;  %p1450_p3 = por %p1449_p2, %p1448_p1 }
  0x2c   : > { %761 = vmatpush.bf16.msrb.mxu3 %v1328_v29  ;;  %681 = vmatpush.bf16.msrb.mxu1 %v1324_v32  ;;  %v1420_v32 = vld [vmem:[%s1983_s6 + $0x3] ss:$0 sm:$0xff] }
  0x2d   : > { %v443_v8 = vsel %vm442_vm1, %v1424_v3, %v441_v7  ;;  %726 = vmatpush.bf16.msrb.mxu2 %v1326_v28  ;;  %p1451_p5 = pnand %p1450_p3, %p1446_p0 }
  0x96   : > { %v436_v9 = vpop.xlane.xlu0 %435 }
  0x97   : > { %v444_v10 = vmul.f32 %v443_v8, %v436_v9 }
  0x99   : > { %v445_v11 = vsub.f32 %v430_v0, %v444_v10  ;;  %v1415_v10 = vld [vmem:[%s1984_s7 + $0x1] ss:$0 sm:$0xff] }
  0x9b   : > { %v446_v12 = vmul.f32 %v445_v11, %v445_v11 }
  0x9d   : > { %v447_v13 = vsel %vm433_vm0, %v446_v12, 0.0 }
  0x9e   : > { %448 = vadd.xlane.f32.xlu0 %v447_v13 }
 0x111   : > { %v449_v22 = vpop.xlane.xlu0 %448 }
 0x112   : > { %v450_v26 = vmul.f32 %v449_v22, %v443_v8 }
 0x114   : > { %v451_v30 = vadd.f32 1e-05, %v450_v26 }
 0x116   : > { %1425 = vrsqrt.f32 %v451_v30  ;;  %vm458_vm3 = vweird.f32 %v451_v30 }
 0x11c   : > { %v1426_v33 = vpop.eup %1425 }
 0x11d   : > { %v453_v34 = vmul.f32 %v1426_v33, %v451_v30  ;;  %vm459_vm2 = vweird.f32 %v1426_v33 }
 0x11e   : > { %vm460_vm4 = vmor %vm458_vm3, %vm459_vm2 }
 0x11f   : > { %v454_v35 = vmul.f32 %v1426_v33, %v453_v34 }
 0x121   : > { %v455_v36 = vmul.f32 0.5, %v454_v35 }
 0x123   : > { %v456_v37 = vsub.f32 1.5, %v455_v36 }
 0x125   : > { %v457_v38 = vmul.f32 %v1426_v33, %v456_v37 }
 0x127   : > { %v461_v40 = vsel %vm460_vm4, %v1426_v33, %v457_v38 }
 0x128   : > { %v462_v42 = vmul.f32 %v461_v40, %v445_v11  ;;  %v1416_v11 = vld [vmem:[%s1985_s8 + $0x1] ss:$0 sm:$0xff] }
 0x12a   : > { %v466_v43 = vmul.f32 %v1409_v39, %v462_v42  ;;  %v1422_v42 = vld [vmem:[%s1985_s8 + $0x3] ss:$0 sm:$0xff] }
 0x12c   : > { %v470_v44 = vadd.f32 %v1410_v41, %v466_v43  ;;  %v1421_v41 = vld [vmem:[%s1984_s7 + $0x3] ss:$0 sm:$0xff] }
 0x12e   : > { %v471_v45 = vpack.c.bf16 %v470_v44, %v470_v44 }
 0x130   : > { %1149 = vmatmul.msk.bf16.vlgmr.msra.gmra.mxu0 %vm433_vm0, %v471_v45  ;;  %1158 = vmatmul.msk.bf16.vlgmr.msra.gmra.mxu1 %vm433_vm0, %v471_v45 }
 0x131   : > { %1167 = vmatmul.msk.bf16.vlgmr.msra.gmra.mxu2 %vm433_vm0, %v471_v45  ;;  %1181 = vmatmul.msk.bf16.vlgmr.msra.gmra.mxu3 %vm433_vm0, %v471_v45 }
 0x132   : > { %875 = vmatpush.bf16.msra.mxu2 %v1335_v46  ;;  %910 = vmatpush.bf16.msra.mxu3 %v1337_v47 }
 0x133   : > { %795 = vmatpush.bf16.msra.mxu0 %v1331_v48  ;;  %840 = vmatpush.bf16.msra.mxu1 %v1333_v49 }
 0x136   : > { %876 = vmatpush.bf16.msra.mxu2 %v1334_v50  ;;  %911 = vmatpush.bf16.msra.mxu3 %v1336_v51 }
 0x137   : > { %796 = vmatpush.bf16.msra.mxu0 %v1330_v52  ;;  %841 = vmatpush.bf16.msra.mxu1 %v1332_v53 }
 0x140   : > { %1195 = vmatmul.msk.bf16.vlgmr.msrb.gmra.mxu0 %vm433_vm0, %v471_v45  ;;  %1209 = vmatmul.msk.bf16.vlgmr.msrb.gmra.mxu1 %vm433_vm0, %v471_v45 }
 0x141   : > { %1226 = vmatmul.msk.bf16.vlgmr.msrb.gmra.mxu2 %vm433_vm0, %v471_v45  ;;  %1240 = vmatmul.msk.bf16.vlgmr.msrb.gmra.mxu3 %vm433_vm0, %v471_v45 }
 0x150   : > { %1254 = vmatmul.msk.bf16.vlgmr.msra.gmra.mxu0 %vm433_vm0, %v471_v45  ;;  %1271 = vmatmul.msk.bf16.vlgmr.msra.gmra.mxu1 %vm433_vm0, %v471_v45 }
 0x151   : > { %1285 = vmatmul.msk.bf16.vlgmr.msra.gmra.mxu2 %vm433_vm0, %v471_v45  ;;  %1299 = vmatmul.msk.bf16.vlgmr.msra.gmra.mxu3 %vm433_vm0, %v471_v45 }
 0x1ad   : > { %v504_v56 = vpop.f32.mrf.mxu0  ;;  %v537_v57 = vpop.f32.mrf.mxu1 }
 0x1ae   : > { %v505_v58 = vadd.f32 %v1411_v54, %v504_v56  ;;  %v538_v59 = vadd.f32 %v1412_v55, %v537_v57 }
 0x1b0   : > { %v574_v60 = vmul.f32 0.35355338, %v505_v58  ;;  %v578_v61 = vpack.c.bf16 %v538_v59, %v538_v59 }
 0x1b2   : > { %v575_v0 = vpack.c.bf16 %v574_v60, %v574_v60  ;;  %579 = vst.msk [vmem:[%s1801_s13] sm:$0xf] %vm576_vm5, %v578_v61 }
 0x1b4   : > { %577 = vst.msk [vmem:[%s1805_s14] sm:$0xf] %vm576_vm5, %v575_v0  ;;  %v570_v1 = vpop.f32.mrf.mxu2  ;;  %v613_v2 = vpop.f32.mrf.mxu3 }
 0x1b5   : > { %v571_v3 = vadd.f32 %v1413_v62, %v570_v1  ;;  %v614_v4 = vadd.f32 %v1414_v63, %v613_v2  ;;  %v506_v5 = vpop.f32.mrf.mxu0  ;;  %v539_v6 = vpop.f32.mrf.mxu1 }
 0x1b7   : > { %v580_v7 = vpack.c.bf16 %v571_v3, %v571_v3  ;;  %v687_v8 = vmul.f32 0.35355338, %v614_v4 }
 0x1b9   : > { %581 = vst.msk [vmem:[%s1809_s15] sm:$0xf] %vm576_vm5, %v580_v7  ;;  %v688_v9 = vpack.c.bf16 %v687_v8, %v687_v8 }
 0x1bb   : > { %1210 = vst.msk [vmem:[%s1805_s14 + $0x4] sm:$0xf] %vm576_vm5, %v688_v9 }
 0x1bc   : > { %v572_v12 = vpop.f32.mrf.mxu2  ;;  %v615_v13 = vpop.f32.mrf.mxu3 }
 0x1bd   : > { %v648_v14 = vpop.f32.mrf.mxu0  ;;  %v683_v15 = vpop.f32.mrf.mxu1 }
 0x1be   : > { %v649_v16 = vadd.f32 %v1415_v10, %v648_v14  ;;  %v684_v17 = vadd.f32 %v1416_v11, %v683_v15 }
 0x1c0   : > { %v691_v18 = vpack.c.bf16 %v649_v16, %v649_v16  ;;  %v694_v19 = vpack.c.bf16 %v684_v17, %v684_v17 }
 0x1c2   : > { %1211 = vst.msk [vmem:[%s1801_s13 + $0x4] sm:$0xf] %vm576_vm5, %v691_v18 }
 0x1c3   : > { %1212 = vst.msk [vmem:[%s1809_s15 + $0x4] sm:$0xf] %vm576_vm5, %v694_v19 }
 0x1c4   : > { %v728_v22 = vpop.f32.mrf.mxu2  ;;  %v763_v23 = vpop.f32.mrf.mxu3 }
 0x1c5   : > { %v729_v24 = vadd.f32 %v1417_v20, %v728_v22  ;;  %v764_v25 = vadd.f32 %v1418_v21, %v763_v23  ;;  %v650_v26 = vpop.f32.mrf.mxu0  ;;  %v685_v27 = vpop.f32.mrf.mxu1 }
 0x1c7   : > { %v802_v28 = vmul.f32 0.35355338, %v729_v24  ;;  %v806_v29 = vpack.c.bf16 %v764_v25, %v764_v25 }
 0x1c9   : > { %v803_v30 = vpack.c.bf16 %v802_v28, %v802_v28  ;;  %1256 = vst.msk [vmem:[%s1801_s13 + $0x8] sm:$0xf] %vm576_vm5, %v806_v29 }
 0x1cb   : > { %1255 = vst.msk [vmem:[%s1805_s14 + $0x8] sm:$0xf] %vm576_vm5, %v803_v30 }
 0x1cc   : > { %v730_v33 = vpop.f32.mrf.mxu2  ;;  %v765_v34 = vpop.f32.mrf.mxu3 }
 0x1cd   : > { %v798_v35 = vpop.f32.mrf.mxu0  ;;  %v843_v36 = vpop.f32.mrf.mxu1 }
 0x1ce   : > { %v799_v37 = vadd.f32 %v1419_v31, %v798_v35  ;;  %v844_v38 = vadd.f32 %v1420_v32, %v843_v36 }
 0x1d0   : > { %v809_v39 = vpack.c.bf16 %v799_v37, %v799_v37  ;;  %v917_v40 = vmul.f32 0.35355338, %v844_v38 }
 0x1d2   : > { %1257 = vst.msk [vmem:[%s1809_s15 + $0x8] sm:$0xf] %vm576_vm5, %v809_v39  ;;  %v918_v43 = vpack.c.bf16 %v917_v40, %v917_v40 }
 0x1d4   : > { %1300 = vst.msk [vmem:[%s1805_s14 + $0xc] sm:$0xf] %vm576_vm5, %v918_v43  ;;  %v878_v44 = vpop.f32.mrf.mxu2  ;;  %v913_v45 = vpop.f32.mrf.mxu3 }
 0x1d5   : > { %v879_v46 = vadd.f32 %v1421_v41, %v878_v44  ;;  %v914_v47 = vadd.f32 %v1422_v42, %v913_v45  ;;  %v800_v48 = vpop.f32.mrf.mxu0  ;;  %v845_v49 = vpop.f32.mrf.mxu1 }
 0x1d6   : > { %1454 = shalt.err (!%p1451_p5)
}
 0x1d7   : > { %s1992_s24 = smov 64   ;;  %s1569_s5 = smov 4   ;;  %v921_v50 = vpack.c.bf16 %v879_v46, %v879_v46  ;;  %v924_v51 = vpack.c.bf16 %v914_v47, %v914_v47 }
 0x1d8   : > { %1341 = dma.vmem_to_hbm [thread:$0]  (%p1672_p4), %s1851_s1, 256, %s954_s26, %s928_s23, %s1992_s24, %s1992_s24, %s1569_s5  }
 0x1d9   : > { %s987_s20 = sshll.u32 %s1809_s15, 4  ;;  %s2010_s14 = scalar_lea.hbm %s1988_s11, %s1834_s16  ;;  %1301 = vst.msk [vmem:[%s1801_s13 + $0xc] sm:$0xf] %vm576_vm5, %v921_v50  ;;  %s1910_s20 = int_to_ptr.vmem [resolvable:$true] %s987_s20 }
 0x1da   : > { %s1905_s28 = sshll.u32 %s2010_s14, 4  ;;  %s2011_s3 = sshll.u32 %s1801_s13, 4  ;;  %1302 = vst.msk [vmem:[%s1809_s15 + $0xc] sm:$0xf] %vm576_vm5, %v924_v51  ;;  %s970_s3 = int_to_ptr.vmem [resolvable:$true] %s2011_s3  ;;  %s990_s28 = int_to_ptr.hbm [resolvable:$true] %s1905_s28 }
 0x1db   : > { %s933_s1 = scalar_lea.sflag [#allocation5], %s1875_s12  ;;  %s1469_s26 = sshra.s32 %s972_s2, 4  ;;  %s1470_s26 = int_to_ptr.hbm [resolvable:$true] %s1469_s26 }
 0x1dc   : > { %s1471_s23 = scalar_lea.hbm %s1470_s26, 16  ;;  %s1475_s4 = scalar_lea.hbm %s1987_s10, 32 }
 0x1dd   : > { %p1472_p6 = scmp.ne.s32.totalorder %s1470_s26, %s1471_s23  ;;  %p1476_p10 = scmp.lt.s32.totalorder %s1470_s26, %s1987_s10 }
 0x1de   : > { %p1477_p11 = scmp.lt.s32.totalorder %s1475_s4, %s1471_s23 }
 0x1df   : > { %p1473_p7 = pnand %p1472_p6, %p1672_p4 }
 0x1e0   : > { %p1478_p12 = por %p1477_p11, %p1476_p10 }
 0x1e1   : > { %p1474_p9 = pneg %p1473_p7 }
 0x1e3   : > { %p1479_p13 = pnand %p1478_p12, %p1474_p9 }
 0x1e5   : > { %1482 = shalt.err (!%p1479_p13)
}
 0x1e6   : > { %s2012_s13 = smov 64   ;;  %v880_v52 = vpop.f32.mrf.mxu2  ;;  %v915_v53 = vpop.f32.mrf.mxu3  ;;  %s1497_s15 = sshra.s32 %s990_s28, 4  ;;  %s1498_s15 = int_to_ptr.hbm [resolvable:$true] %s1497_s15 }
 0x1e7   : > { %1342 = dma.vmem_to_hbm [thread:$0]  (%p1672_p4), %s970_s3, 256, %s972_s2, %s933_s1, %s2012_s13, %s2012_s13, %s1569_s5  }
 0x1e8   : > { %s1499_s24 = scalar_lea.hbm %s1498_s15, 16  ;;  %s1503_s16 = scalar_lea.hbm %s1988_s11, 32 }
 0x1e9   : > { %p1500_p0 = scmp.ne.s32.totalorder %s1498_s15, %s1499_s24  ;;  %p1504_p3 = scmp.lt.s32.totalorder %s1498_s15, %s1988_s11 }
 0x1ea   : > { %p1505_p5 = scmp.lt.s32.totalorder %s1503_s16, %s1499_s24 }
 0x1eb   : > { %p1501_p1 = pnand %p1500_p0, %p1672_p4 }
 0x1ec   : > { %p1506_p6 = por %p1505_p5, %p1504_p3 }
 0x1ed   : > { %p1502_p2 = pneg %p1501_p1 }
 0x1ef   : > { %p1507_p7 = pnand %p1506_p6, %p1502_p2 }
 0x1f1   : > { %1510 = shalt.err (!%p1507_p7)
}
 0x1f2   : > { %1343 = dma.vmem_to_hbm [thread:$0]  (%p1672_p4), %s1910_s20, 256, %s990_s28, %s933_s1, %s2012_s13, %s2012_s13, %s1569_s5  }
 0x1f3 PF: > { %p1357_p9 = scmp.ge.s32.totalorder %s1565_s22, 2  ;;  %s1004_s2 = sand.u32 1, %s1545_s17  }
 0x1f4   : > { %s1005_s3 = scalar_lea.sflag [#allocation3], %s1004_s2 }
 0x1f5   : > { %p1348_p10 = pnand %p1357_p9, %p1681_p8 }
 0x1f7   : > { %p1349_p11 = pneg %p1348_p10 }
 0x1f9   : > { %1536 = dma.done.wait (%p1349_p11), %s1005_s3, 256  }
 0x1fa   : > { %1538 = vsyncadd (%p1349_p11), %s1005_s3, 4294967040  ;;  %s2013_s27 = sadd.s32 4294967294, %s1565_s22  }
 0x1fb   : > { %s1014_s14 = sand.u32 1, %s2013_s27  }
 0x1fc   : > { %s1015_s12 = scalar_lea.sflag [#allocation5], %s1014_s14 }
 0x1fd   : > { %1540 = dma.done.wait (%p1349_p11), %s1015_s12, 512  }
 0x1fe   : > { %1542 = vsyncadd (%p1349_p11), %s1015_s12, 4294966784  ;;  %s28_s22 = sadd.s32 1, %s1565_s22   ;;  %s2014_s17 = smov %s1549_s18 }
 0x1ff   : > { %p25_p4 = scmp.ge.s32.totalorder %s28_s22, 4   ;;  %s2015_s18 = smov %s1553_s19 }
 0x200   : > { %s2016_s19 = smov %s1687_s30  ;;  %s2017_s20 = smov %s1561_s21 }
 0x201   : > { %s2018_s21 = smov %s2020_s25  ;;  %27 = sbr.rel (!%p25_p4) target bundleno = 13 (0xd), region = 150 }
 0x206   :  { %1031 = vsyncpa [#allocation3], 1 }
 0x207   :  { %1033 = vsyncpa [#allocation3 + $0x1], 1 }
 0x208   :  { %1034 = vsyncpa [#allocation5], 1 }
 0x209   :  { %1036 = vsyncpa [#allocation5 + $0x1], 1 }

// kernel: tpu_custom_call.1
= control target key start
LH: loop header
LB: loop body
LE: loop exit
PB: predicated region body
PF: predicated region fallthrough
CT: control target
= control target key end

     0   :  { %s1977_s0 = inlined_call_operand.vmem [shape: f32[2,8,32], index: 0, kind: input, shape index: {}]   ;;  %s1978_s1 = inlined_call_operand.vmem [shape: f32[1,32], index: 1, kind: input, shape index: {}]   ;;  %s1979_s2 = inlined_call_operand.vmem [shape: f32[1,32], index: 2, kind: input, shape index: {}]   ;;  %s1980_s3 = inlined_call_operand.vmem [shape: bf16[4,32,8], index: 3, kind: input, shape index: {}]   ;;  %s1981_s4 = inlined_call_operand.vmem [shape: bf16[4,32,8], index: 4, kind: input, shape index: {}]   ;;  %s1982_s5 = inlined_call_operand.vmem [shape: bf16[4,32,8], index: 5, kind: input, shape index: {}]   ;;  %s1983_s6 = inlined_call_operand.vmem [shape: f32[4,1,8], index: 6, kind: input, shape index: {}]   ;;  %s1984_s7 = inlined_call_operand.vmem [shape: f32[4,1,8], index: 7, kind: input, shape index: {}]   ;;  %s1985_s8 = inlined_call_operand.vmem [shape: f32[4,1,8], index: 8, kind: input, shape index: {}]   ;;  %s1986_s9 = inlined_call_operand.hbm [shape: bf16[2,4,8,8], index: 9, kind: output, shape index: {0}]   ;;  %s1987_s10 = inlined_call_operand.hbm [shape: bf16[2,4,8,8], index: 10, kind: output, shape index: {1}]   ;;  %s1988_s11 = inlined_call_operand.hbm [shape: bf16[2,4,8,8], index: 11, kind: output, shape index: {2}]  }
   0x1   :  { %1994 = sst [smem:[#allocation9_spill]] %s1977_s0 }
   0x2   :  { %1995 = sst [smem:[#allocation10_spill]] %s1978_s1 }
   0x3   :  { %1996 = sst [smem:[#allocation11_spill]] %s1979_s2 }
   0x4   :  { %1997 = sst [smem:[#allocation12_spill]] %s1980_s3 }
   0x5   :  { %1998 = sst [smem:[#allocation13_spill]] %s1981_s4 }
   0x6   :  { %1999 = sst [smem:[#allocation14_spill]] %s1982_s5 }
   0x7   :  { %17 = vsyncpa [#allocation3], 0 }
   0x8   :  { %19 = vsyncpa [#allocation3 + $0x1], 0 }
   0x9   :  { %20 = vsyncpa [#allocation5], 0 }
   0xa   :  { %22 = vsyncpa [#allocation5 + $0x1], 0  ;;  %s1630_s17 = smov 0   ;;  %s1632_s18 = smov 0  }
   0xb   :  { %s1634_s19 = smov 0   ;;  %s1636_s20 = smov 0  }
   0xc   :  { %s1638_s21 = smov 0   ;;  %s1640_s22 = smov 0  }
   0xd LB: > { %s1990_s23 = sadd.s32 4294967295, %s1565_s22   ;;  %s1989_s24 = sadd.s32 4294967294, %s1565_s22   ;;  %s1565_s22 = sphi %s1640_s22, %s28_s22   ;;  %s1561_s21 = sphi %s1638_s21, %s2018_s21   ;;  %s1557_s20 = sphi %s1636_s20, %s2017_s20   ;;  %s1553_s19 = sphi %s1634_s19, %s2016_s19   ;;  %s1549_s18 = sphi %s1632_s18, %s2015_s18   ;;  %s1545_s17 = sphi %s1630_s17, %s2014_s17  }
   0xe   : > { %s40_s25 = sadd.s32 1, %s1561_s21  ;;  %s245_s26 = sadd.s32 1, %s1553_s19 }
   0xf   : > { %p42_p0 = scmp.ge.s32.totalorder %s40_s25, 2  ;;  %p255_p1 = scmp.ne.s32.totalorder %s1553_s19, %s1549_s18 }
  0x10   : > { %p256_p2 = scmp.eq.s32.totalorder %s1990_s23, 1  ;;  %p261_p3 = scmp.ne.s32.totalorder %s1549_s18, %s1545_s17 }
  0x11   : > { %s2020_s25 = smov (%p42_p0, %s40_s25), 0  ;;  %p262_p5 = scmp.eq.s32.totalorder %s1989_s24, 1 }
  0x12   : > { %p1672_p4 = por %p256_p2, %p255_p1  ;;  %s240_s28 = ssub.s32 %s1561_s21, %s2020_s25 }
  0x13   : > { %p1136_p6 = scmp.ge.s32.totalorder %s1565_s22, 1  ;;  %p243_p7 = scmp.eq.s32.totalorder %s240_s28, 0 }
  0x14   : > { %p1681_p8 = por %p262_p5, %p261_p3  ;;  %p370_p9 = scmp.lt.s32.totalorder %s1565_s22, 3 }
  0x15   : > { %s1687_s30 = scalar_select %p243_p7, %s1553_s19, %s245_s26  }
  0x16   : > { %p371_p10 = pnand %p1136_p6, %p370_p9 }
  0x17   : > { %p422_p11 = scmp.lt.s32.totalorder (!%p371_p10), %s1557_s20, 1  ;;  %s2002_s0 = sld [smem:[#allocation9_spill]] (!%p371_p10) }
  0x18   : > { %374 = sbr.rel (%p371_p10) target bundleno = 499 (0x1f3), region = 56  ;;  %s2003_s3 = sld [smem:[#allocation12_spill]] (!%p371_p10) }
  0x19   : > { %s2004_s4 = sld [smem:[#allocation13_spill]] (!%p371_p10)  ;;  %s2008_s28 = sadd.s32 (!%p371_p10), 4294967295, %s1565_s22  }
  0x1a   : > { %s2005_s5 = sld [smem:[#allocation14_spill]] (!%p371_p10)  ;;  %s2009_s24 = sand.u32 (!%p371_p10), 1, %s1549_s18  }
  0x1b   : > { %s2006_s1 = sld [smem:[#allocation10_spill]] (!%p371_p10)  ;;  %s928_s23 = scalar_lea.sflag (!%p371_p10), [#allocation3], %s2009_s24 }
  0x1c   : > { %s2007_s2 = sld [smem:[#allocation11_spill]] (!%p371_p10) }
  0x1d   : > { %s423_s12 = scalar_select %p422_p11, %s1557_s20, 1  ;;  %vm433_vm0 = vcmask 261120   ;;  %v1567_v2 = vmov 32.0   ;;  %v1411_v54 = vld [vmem:[%s1983_s6] ss:$0 sm:$0xff]  ;;  %vm576_vm5 = vcmask 60416  }
  0x1e   : > { %1423 = vrcp.f32 %v1567_v2  ;;  %v1315_v14 = vld [vmem:[%s2003_s3 + $0x8] sm:$0xff]  ;;  %v1321_v17 = vld [vmem:[%s2003_s3 + $0x18] sm:$0xff]  ;;  %v1314_v18 = vld [vmem:[%s2003_s3] sm:$0xff] }
  0x1f   : > { %s1140_s13 = sshll.u32 %s423_s12, 3  ;;  %v1317_v15 = vld [vmem:[%s2004_s4 + $0x8] sm:$0xff]  ;;  %501 = vmatpush.bf16.msra.mxu0 %v1315_v14  ;;  %610 = vmatpush.bf16.msra.mxu3 %v1321_v17  ;;  %v1316_v19 = vld [vmem:[%s2004_s4] sm:$0xff]  ;;  %v1320_v21 = vld [vmem:[%s2003_s3 + $0x10] sm:$0xff]  ;;  %s1991_s12 = sand.u32 1, %s1549_s18  }
  0x20   : > { %s428_s16 = scalar_lea.vmem %s2002_s0, %s1140_s13  ;;  %v1319_v16 = vld [vmem:[%s2005_s5 + $0x8] sm:$0xff]  ;;  %534 = vmatpush.bf16.msra.mxu1 %v1317_v15  ;;  %v1318_v20 = vld [vmem:[%s2005_s5] sm:$0xff]  ;;  %v1323_v25 = vld [vmem:[%s2004_s4 + $0x18] sm:$0xff]  ;;  %s1137_s0 = sshll.u32 %s1991_s12, 4 }
  0x21   : > { %v430_v0 = vld [vmem:[%s428_s16] sm:$0xff]  ;;  %567 = vmatpush.bf16.msra.mxu2 %v1319_v16  ;;  %v1327_v23 = vld [vmem:[%s2003_s3 + $0x28] sm:$0xff]  ;;  %v1325_v27 = vld [vmem:[%s2005_s5 + $0x18] sm:$0xff]  ;;  %s1801_s13 = scalar_lea.vmem [#allocation4], %s1137_s0  ;;  %s1805_s14 = scalar_lea.vmem [#allocation2], %s1137_s0 }
  0x22   : > { %v434_v1 = vsel %vm433_vm0, %v430_v0, 0.0  ;;  %v1329_v24 = vld [vmem:[%s2004_s4 + $0x28] sm:$0xff]  ;;  %v1326_v28 = vld [vmem:[%s2003_s3 + $0x20] sm:$0xff]  ;;  %v1322_v31 = vld [vmem:[%s2004_s4 + $0x10] sm:$0xff]  ;;  %s1809_s15 = scalar_lea.vmem [#allocation6], %s1137_s0  ;;  %s1834_s16 = sshll.u32 %s1557_s20, 4 }
  0x23   : > { %435 = vadd.xlane.f32.xlu0 %v434_v1  ;;  %502 = vmatpush.bf16.msra.mxu0 %v1314_v18  ;;  %v1328_v29 = vld [vmem:[%s2004_s4 + $0x20] sm:$0xff]  ;;  %v1324_v32 = vld [vmem:[%s2005_s5 + $0x10] sm:$0xff]  ;;  %v1335_v46 = vld [vmem:[%s2004_s4 + $0x38] sm:$0xff]  ;;  %s950_s20 = scalar_lea.hbm %s1986_s9, %s1834_s16  ;;  %s1875_s12 = sand.u32 1, %s2008_s28  }
  0x24   : > { %v1424_v3 = vpop.eup %1423  ;;  %535 = vmatpush.bf16.msra.mxu1 %v1316_v19  ;;  %611 = vmatpush.bf16.msra.mxu3 %v1320_v21  ;;  %v1409_v39 = vld [vmem:[%s2006_s1] ss:$0 sm:$0xff]  ;;  %v1337_v47 = vld [vmem:[%s2005_s5 + $0x38] sm:$0xff]  ;;  %v1331_v48 = vld [vmem:[%s2005_s5 + $0x28] sm:$0xff]  ;;  %s951_s1 = sshll.u32 %s1805_s14, 4  ;;  %s1849_s26 = sshll.u32 %s950_s20, 4  ;;  %s1851_s1 = int_to_ptr.vmem [resolvable:$true] %s951_s1  ;;  %s954_s26 = int_to_ptr.hbm [resolvable:$true] %s1849_s26 }
  0x25   : > { %v438_v4 = vmul.f32 32.0, %v1424_v3  ;;  %vm442_vm1 = vweird.f32 %v1424_v3  ;;  %568 = vmatpush.bf16.msra.mxu2 %v1318_v20  ;;  %v1410_v41 = vld [vmem:[%s2007_s2] ss:$0 sm:$0xff]  ;;  %v1333_v49 = vld [vmem:[%s2003_s3 + $0x38] sm:$0xff]  ;;  %v1334_v50 = vld [vmem:[%s2004_s4 + $0x30] sm:$0xff]  ;;  %s1441_s20 = sshra.s32 %s954_s26, 4  ;;  %s1442_s20 = int_to_ptr.hbm [resolvable:$true] %s1441_s20 }
  0x26   : > { %v1336_v51 = vld [vmem:[%s2005_s5 + $0x30] sm:$0xff]  ;;  %v1330_v52 = vld [vmem:[%s2005_s5 + $0x20] sm:$0xff]  ;;  %s1443_s4 = scalar_lea.hbm %s1442_s20, 16  ;;  %s1447_s28 = scalar_lea.hbm %s1986_s9, 32 }
  0x27   : > { %v439_v5 = vsub.f32 1.0, %v438_v4  ;;  %645 = vmatpush.bf16.msrb.mxu0 %v1323_v25  ;;  %v1332_v53 = vld [vmem:[%s2003_s3 + $0x30] sm:$0xff]  ;;  %v1412_v55 = vld [vmem:[%s1984_s7] ss:$0 sm:$0xff]  ;;  %v1414_v63 = vld [vmem:[%s1983_s6 + $0x1] ss:$0 sm:$0xff]  ;;  %s968_s3 = scalar_lea.hbm %s1987_s10, %s1834_s16  ;;  %p1444_p12 = scmp.ne.s32.totalorder %s1442_s20, %s1443_s4 }
  0x28   : > { %760 = vmatpush.bf16.msrb.mxu3 %v1329_v24  ;;  %680 = vmatpush.bf16.msrb.mxu1 %v1325_v27  ;;  %v1413_v62 = vld [vmem:[%s1985_s8] ss:$0 sm:$0xff]  ;;  %v1417_v20 = vld [vmem:[%s1983_s6 + $0x2] ss:$0 sm:$0xff]  ;;  %s1877_s2 = sshll.u32 %s968_s3, 4  ;;  %p1448_p1 = scmp.lt.s32.totalorder %s1442_s20, %s1986_s9  ;;  %s972_s2 = int_to_ptr.hbm [resolvable:$true] %s1877_s2 }
  0x29   : > { %v440_v6 = vmul.f32 %v1424_v3, %v439_v5  ;;  %725 = vmatpush.bf16.msrb.mxu2 %v1327_v23  ;;  %v1418_v21 = vld [vmem:[%s1984_s7 + $0x2] ss:$0 sm:$0xff]  ;;  %p1445_p13 = pnand %p1444_p12, %p1672_p4  ;;  %p1449_p2 = scmp.lt.s32.totalorder %s1447_s28, %s1443_s4 }
  0x2b   : > { %v441_v7 = vadd.f32 %v1424_v3, %v440_v6  ;;  %646 = vmatpush.bf16.msrb.mxu0 %v1322_v31  ;;  %v1419_v31 = vld [vmem:[%s1985_s8 + $0x2] ss:$0 sm:$0xff]  ;;  %p1446_p0 = pneg %p1445_p13  ;;  %p1450_p3 = por %p1449_p2, %p1448_p1 }
  0x2c   : > { %761 = vmatpush.bf16.msrb.mxu3 %v1328_v29  ;;  %681 = vmatpush.bf16.msrb.mxu1 %v1324_v32  ;;  %v1420_v32 = vld [vmem:[%s1983_s6 + $0x3] ss:$0 sm:$0xff] }
  0x2d   : > { %v443_v8 = vsel %vm442_vm1, %v1424_v3, %v441_v7  ;;  %726 = vmatpush.bf16.msrb.mxu2 %v1326_v28  ;;  %p1451_p5 = pnand %p1450_p3, %p1446_p0 }
  0x96   : > { %v436_v9 = vpop.xlane.xlu0 %435 }
  0x97   : > { %v444_v10 = vmul.f32 %v443_v8, %v436_v9 }
  0x99   : > { %v445_v11 = vsub.f32 %v430_v0, %v444_v10  ;;  %v1415_v10 = vld [vmem:[%s1984_s7 + $0x1] ss:$0 sm:$0xff] }
  0x9b   : > { %v446_v12 = vmul.f32 %v445_v11, %v445_v11 }
  0x9d   : > { %v447_v13 = vsel %vm433_vm0, %v446_v12, 0.0 }
  0x9e   : > { %448 = vadd.xlane.f32.xlu0 %v447_v13 }
 0x111   : > { %v449_v22 = vpop.xlane.xlu0 %448 }
 0x112   : > { %v450_v26 = vmul.f32 %v449_v22, %v443_v8 }
 0x114   : > { %v451_v30 = vadd.f32 1e-05, %v450_v26 }
 0x116   : > { %1425 = vrsqrt.f32 %v451_v30  ;;  %vm458_vm3 = vweird.f32 %v451_v30 }
 0x11c   : > { %v1426_v33 = vpop.eup %1425 }
 0x11d   : > { %v453_v34 = vmul.f32 %v1426_v33, %v451_v30  ;;  %vm459_vm2 = vweird.f32 %v1426_v33 }
 0x11e   : > { %vm460_vm4 = vmor %vm458_vm3, %vm459_vm2 }
 0x11f   : > { %v454_v35 = vmul.f32 %v1426_v33, %v453_v34 }
 0x121   : > { %v455_v36 = vmul.f32 0.5, %v454_v35 }
 0x123   : > { %v456_v37 = vsub.f32 1.5, %v455_v36 }
 0x125   : > { %v457_v38 = vmul.f32 %v1426_v33, %v456_v37 }
 0x127   : > { %v461_v40 = vsel %vm460_vm4, %v1426_v33, %v457_v38 }
 0x128   : > { %v462_v42 = vmul.f32 %v461_v40, %v445_v11  ;;  %v1416_v11 = vld [vmem:[%s1985_s8 + $0x1] ss:$0 sm:$0xff] }
 0x12a   : > { %v466_v43 = vmul.f32 %v1409_v39, %v462_v42  ;;  %v1422_v42 = vld [vmem:[%s1985_s8 + $0x3] ss:$0 sm:$0xff] }
 0x12c   : > { %v470_v44 = vadd.f32 %v1410_v41, %v466_v43  ;;  %v1421_v41 = vld [vmem:[%s1984_s7 + $0x3] ss:$0 sm:$0xff] }
 0x12e   : > { %v471_v45 = vpack.c.bf16 %v470_v44, %v470_v44 }
 0x130   : > { %1149 = vmatmul.msk.bf16.vlgmr.msra.gmra.mxu0 %vm433_vm0, %v471_v45  ;;  %1158 = vmatmul.msk.bf16.vlgmr.msra.gmra.mxu1 %vm433_vm0, %v471_v45 }
 0x131   : > { %1167 = vmatmul.msk.bf16.vlgmr.msra.gmra.mxu2 %vm433_vm0, %v471_v45  ;;  %1181 = vmatmul.msk.bf16.vlgmr.msra.gmra.mxu3 %vm433_vm0, %v471_v45 }
 0x132   : > { %875 = vmatpush.bf16.msra.mxu2 %v1335_v46  ;;  %910 = vmatpush.bf16.msra.mxu3 %v1337_v47 }
 0x133   : > { %795 = vmatpush.bf16.msra.mxu0 %v1331_v48  ;;  %840 = vmatpush.bf16.msra.mxu1 %v1333_v49 }
 0x136   : > { %876 = vmatpush.bf16.msra.mxu2 %v1334_v50  ;;  %911 = vmatpush.bf16.msra.mxu3 %v1336_v51 }
 0x137   : > { %796 = vmatpush.bf16.msra.mxu0 %v1330_v52  ;;  %841 = vmatpush.bf16.msra.mxu1 %v1332_v53 }
 0x140   : > { %1195 = vmatmul.msk.bf16.vlgmr.msrb.gmra.mxu0 %vm433_vm0, %v471_v45  ;;  %1209 = vmatmul.msk.bf16.vlgmr.msrb.gmra.mxu1 %vm433_vm0, %v471_v45 }
 0x141   : > { %1226 = vmatmul.msk.bf16.vlgmr.msrb.gmra.mxu2 %vm433_vm0, %v471_v45  ;;  %1240 = vmatmul.msk.bf16.vlgmr.msrb.gmra.mxu3 %vm433_vm0, %v471_v45 }
 0x150   : > { %1254 = vmatmul.msk.bf16.vlgmr.msra.gmra.mxu0 %vm433_vm0, %v471_v45  ;;  %1271 = vmatmul.msk.bf16.vlgmr.msra.gmra.mxu1 %vm433_vm0, %v471_v45 }
 0x151   : > { %1285 = vmatmul.msk.bf16.vlgmr.msra.gmra.mxu2 %vm433_vm0, %v471_v45  ;;  %1299 = vmatmul.msk.bf16.vlgmr.msra.gmra.mxu3 %vm433_vm0, %v471_v45 }
 0x1ad   : > { %v504_v56 = vpop.f32.mrf.mxu0  ;;  %v537_v57 = vpop.f32.mrf.mxu1 }
 0x1ae   : > { %v505_v58 = vadd.f32 %v1411_v54, %v504_v56  ;;  %v538_v59 = vadd.f32 %v1412_v55, %v537_v57 }
 0x1b0   : > { %v574_v60 = vmul.f32 0.35355338, %v505_v58  ;;  %v578_v61 = vpack.c.bf16 %v538_v59, %v538_v59 }
 0x1b2   : > { %v575_v0 = vpack.c.bf16 %v574_v60, %v574_v60  ;;  %579 = vst.msk [vmem:[%s1801_s13] sm:$0xf] %vm576_vm5, %v578_v61 }
 0x1b4   : > { %577 = vst.msk [vmem:[%s1805_s14] sm:$0xf] %vm576_vm5, %v575_v0  ;;  %v570_v1 = vpop.f32.mrf.mxu2  ;;  %v613_v2 = vpop.f32.mrf.mxu3 }
 0x1b5   : > { %v571_v3 = vadd.f32 %v1413_v62, %v570_v1  ;;  %v614_v4 = vadd.f32 %v1414_v63, %v613_v2  ;;  %v506_v5 = vpop.f32.mrf.mxu0  ;;  %v539_v6 = vpop.f32.mrf.mxu1 }
 0x1b7   : > { %v580_v7 = vpack.c.bf16 %v571_v3, %v571_v3  ;;  %v687_v8 = vmul.f32 0.35355338, %v614_v4 }
 0x1b9   : > { %581 = vst.msk [vmem:[%s1809_s15] sm:$0xf] %vm576_vm5, %v580_v7  ;;  %v688_v9 = vpack.c.bf16 %v687_v8, %v687_v8 }
 0x1bb   : > { %1210 = vst.msk [vmem:[%s1805_s14 + $0x4] sm:$0xf] %vm576_vm5, %v688_v9 }
 0x1bc   : > { %v572_v12 = vpop.f32.mrf.mxu2  ;;  %v615_v13 = vpop.f32.mrf.mxu3 }
 0x1bd   : > { %v648_v14 = vpop.f32.mrf.mxu0  ;;  %v683_v15 = vpop.f32.mrf.mxu1 }
 0x1be   : > { %v649_v16 = vadd.f32 %v1415_v10, %v648_v14  ;;  %v684_v17 = vadd.f32 %v1416_v11, %v683_v15 }
 0x1c0   : > { %v691_v18 = vpack.c.bf16 %v649_v16, %v649_v16  ;;  %v694_v19 = vpack.c.bf16 %v684_v17, %v684_v17 }
 0x1c2   : > { %1211 = vst.msk [vmem:[%s1801_s13 + $0x4] sm:$0xf] %vm576_vm5, %v691_v18 }
 0x1c3   : > { %1212 = vst.msk [vmem:[%s1809_s15 + $0x4] sm:$0xf] %vm576_vm5, %v694_v19 }
 0x1c4   : > { %v728_v22 = vpop.f32.mrf.mxu2  ;;  %v763_v23 = vpop.f32.mrf.mxu3 }
 0x1c5   : > { %v729_v24 = vadd.f32 %v1417_v20, %v728_v22  ;;  %v764_v25 = vadd.f32 %v1418_v21, %v763_v23  ;;  %v650_v26 = vpop.f32.mrf.mxu0  ;;  %v685_v27 = vpop.f32.mrf.mxu1 }
 0x1c7   : > { %v802_v28 = vmul.f32 0.35355338, %v729_v24  ;;  %v806_v29 = vpack.c.bf16 %v764_v25, %v764_v25 }
 0x1c9   : > { %v803_v30 = vpack.c.bf16 %v802_v28, %v802_v28  ;;  %1256 = vst.msk [vmem:[%s1801_s13 + $0x8] sm:$0xf] %vm576_vm5, %v806_v29 }
 0x1cb   : > { %1255 = vst.msk [vmem:[%s1805_s14 + $0x8] sm:$0xf] %vm576_vm5, %v803_v30 }
 0x1cc   : > { %v730_v33 = vpop.f32.mrf.mxu2  ;;  %v765_v34 = vpop.f32.mrf.mxu3 }
 0x1cd   : > { %v798_v35 = vpop.f32.mrf.mxu0  ;;  %v843_v36 = vpop.f32.mrf.mxu1 }
 0x1ce   : > { %v799_v37 = vadd.f32 %v1419_v31, %v798_v35  ;;  %v844_v38 = vadd.f32 %v1420_v32, %v843_v36 }
 0x1d0   : > { %v809_v39 = vpack.c.bf16 %v799_v37, %v799_v37  ;;  %v917_v40 = vmul.f32 0.35355338, %v844_v38 }
 0x1d2   : > { %1257 = vst.msk [vmem:[%s1809_s15 + $0x8] sm:$0xf] %vm576_vm5, %v809_v39  ;;  %v918_v43 = vpack.c.bf16 %v917_v40, %v917_v40 }
 0x1d4   : > { %1300 = vst.msk [vmem:[%s1805_s14 + $0xc] sm:$0xf] %vm576_vm5, %v918_v43  ;;  %v878_v44 = vpop.f32.mrf.mxu2  ;;  %v913_v45 = vpop.f32.mrf.mxu3 }
 0x1d5   : > { %v879_v46 = vadd.f32 %v1421_v41, %v878_v44  ;;  %v914_v47 = vadd.f32 %v1422_v42, %v913_v45  ;;  %v800_v48 = vpop.f32.mrf.mxu0  ;;  %v845_v49 = vpop.f32.mrf.mxu1 }
 0x1d6   : > { %1454 = shalt.err (!%p1451_p5)
}
 0x1d7   : > { %s1992_s24 = smov 64   ;;  %s1569_s5 = smov 4   ;;  %v921_v50 = vpack.c.bf16 %v879_v46, %v879_v46  ;;  %v924_v51 = vpack.c.bf16 %v914_v47, %v914_v47 }
 0x1d8   : > { %1341 = dma.vmem_to_hbm [thread:$0]  (%p1672_p4), %s1851_s1, 256, %s954_s26, %s928_s23, %s1992_s24, %s1992_s24, %s1569_s5  }
 0x1d9   : > { %s987_s20 = sshll.u32 %s1809_s15, 4  ;;  %s2010_s14 = scalar_lea.hbm %s1988_s11, %s1834_s16  ;;  %1301 = vst.msk [vmem:[%s1801_s13 + $0xc] sm:$0xf] %vm576_vm5, %v921_v50  ;;  %s1910_s20 = int_to_ptr.vmem [resolvable:$true] %s987_s20 }
 0x1da   : > { %s1905_s28 = sshll.u32 %s2010_s14, 4  ;;  %s2011_s3 = sshll.u32 %s1801_s13, 4  ;;  %1302 = vst.msk [vmem:[%s1809_s15 + $0xc] sm:$0xf] %vm576_vm5, %v924_v51  ;;  %s970_s3 = int_to_ptr.vmem [resolvable:$true] %s2011_s3  ;;  %s990_s28 = int_to_ptr.hbm [resolvable:$true] %s1905_s28 }
 0x1db   : > { %s933_s1 = scalar_lea.sflag [#allocation5], %s1875_s12  ;;  %s1469_s26 = sshra.s32 %s972_s2, 4  ;;  %s1470_s26 = int_to_ptr.hbm [resolvable:$true] %s1469_s26 }
 0x1dc   : > { %s1471_s23 = scalar_lea.hbm %s1470_s26, 16  ;;  %s1475_s4 = scalar_lea.hbm %s1987_s10, 32 }
 0x1dd   : > { %p1472_p6 = scmp.ne.s32.totalorder %s1470_s26, %s1471_s23  ;;  %p1476_p10 = scmp.lt.s32.totalorder %s1470_s26, %s1987_s10 }
 0x1de   : > { %p1477_p11 = scmp.lt.s32.totalorder %s1475_s4, %s1471_s23 }
 0x1df   : > { %p1473_p7 = pnand %p1472_p6, %p1672_p4 }
 0x1e0   : > { %p1478_p12 = por %p1477_p11, %p1476_p10 }
 0x1e1   : > { %p1474_p9 = pneg %p1473_p7 }
 0x1e3   : > { %p1479_p13 = pnand %p1478_p12, %p1474_p9 }
 0x1e5   : > { %1482 = shalt.err (!%p1479_p13)
}
 0x1e6   : > { %s2012_s13 = smov 64   ;;  %v880_v52 = vpop.f32.mrf.mxu2  ;;  %v915_v53 = vpop.f32.mrf.mxu3  ;;  %s1497_s15 = sshra.s32 %s990_s28, 4  ;;  %s1498_s15 = int_to_ptr.hbm [resolvable:$true] %s1497_s15 }
 0x1e7   : > { %1342 = dma.vmem_to_hbm [thread:$0]  (%p1672_p4), %s970_s3, 256, %s972_s2, %s933_s1, %s2012_s13, %s2012_s13, %s1569_s5  }
 0x1e8   : > { %s1499_s24 = scalar_lea.hbm %s1498_s15, 16  ;;  %s1503_s16 = scalar_lea.hbm %s1988_s11, 32 }
 0x1e9   : > { %p1500_p0 = scmp.ne.s32.totalorder %s1498_s15, %s1499_s24  ;;  %p1504_p3 = scmp.lt.s32.totalorder %s1498_s15, %s1988_s11 }
 0x1ea   : > { %p1505_p5 = scmp.lt.s32.totalorder %s1503_s16, %s1499_s24 }
 0x1eb   : > { %p1501_p1 = pnand %p1500_p0, %p1672_p4 }
 0x1ec   : > { %p1506_p6 = por %p1505_p5, %p1504_p3 }
 0x1ed   : > { %p1502_p2 = pneg %p1501_p1 }
 0x1ef   : > { %p1507_p7 = pnand %p1506_p6, %p1502_p2 }
 0x1f1   : > { %1510 = shalt.err (!%p1507_p7)
}
 0x1f2   : > { %1343 = dma.vmem_to_hbm [thread:$0]  (%p1672_p4), %s1910_s20, 256, %s990_s28, %s933_s1, %s2012_s13, %s2012_s13, %s1569_s5  }
 0x1f3 PF: > { %p1357_p9 = scmp.ge.s32.totalorder %s1565_s22, 2  ;;  %s1004_s2 = sand.u32 1, %s1545_s17  }
 0x1f4   : > { %s1005_s3 = scalar_lea.sflag [#allocation3], %s1004_s2 }
 0x1f5   : > { %p1348_p10 = pnand %p1357_p9, %p1681_p8 }
 0x1f7   : > { %p1349_p11 = pneg %p1348_p10 }
 0x1f9   : > { %1536 = dma.done.wait (%p1349_p11), %s1005_s3, 256  }
 0x1fa   : > { %1538 = vsyncadd (%p1349_p11), %s1005_s3, 4294967040  ;;  %s2013_s27 = sadd.s32 4294967294, %s1565_s22  }
 0x1fb   : > { %s1014_s14 = sand.u32 1, %s2013_s27  }
 0x1fc   : > { %s1015_s12 = scalar_lea.sflag [#allocation5], %s1014_s14 }
 0x1fd   : > { %1540 = dma.done.wait (%p1349_p11), %s1015_s12, 512  }
 0x1fe   : > { %1542 = vsyncadd (%p1349_p11), %s1015_s12, 4294966784  ;;  %s28_s22 = sadd.s32 1, %s1565_s22   ;;  %s2014_s17 = smov %s1549_s18 }
 0x1ff   : > { %p25_p4 = scmp.ge.s32.totalorder %s28_s22, 4   ;;  %s2015_s18 = smov %s1553_s19 }
 0x200   : > { %s2016_s19 = smov %s1687_s30  ;;  %s2017_s20 = smov %s1561_s21 }
 0x201   : > { %s2018_s21 = smov %s2020_s25  ;;  %27 = sbr.rel (!%p25_p4) target bundleno = 13 (0xd), region = 150 }
 0x206   :  { %1031 = vsyncpa [#allocation3], 1 }
 0x207   :  { %1033 = vsyncpa [#allocation3 + $0x1], 1 }
 0x208   :  { %1034 = vsyncpa [#allocation5], 1 }
 0x209   :  { %1036 = vsyncpa [#allocation5 + $0x1], 1 }

</bundles_post_ra>
